<compile_context>
chip_gen: v7x
topology: tpu7x:2x2x1
jax: 0.10.0
libtpu: 0.0.40
codegen_flags: <defaults>
</compile_context>

<pallas_src>
import functools

import jax
import jax.numpy as jnp
import numpy as np
from jax.experimental import pallas as pl
from jax.experimental.pallas import tpu as pltpu


# ------------------------- deterministic parameters ------------------------- #
def _gauss1d(ksize: int = 7, sigma: float = 1.0):
    # kornia get_gaussian_kernel1d: x = arange(ksize) - ksize//2, normalized to sum 1
    x = np.arange(ksize, dtype=np.float64) - ksize // 2
    g = np.exp(-(x ** 2) / (2.0 * sigma ** 2))
    g = g / g.sum()
    return tuple(float(v) for v in g)


GAUSS7 = _gauss1d(7, 1.0)   # symmetric: g[0]=g[6], g[1]=g[5], g[2]=g[4]


# ------------------------------ fused Pallas kernel -------------------------- #
def _harris_kernel(x_ref, out_ref, xpad_ref, prod_ref, hpad_ref, *, k, plane_w):
    """Fused: sobel -> products -> separable 7x7 gaussian -> harris score.

    x_ref    : (Pb, H, Wp)       packed input planes (g planes along lanes)
    out_ref  : (Pb, H, Wp)       packed harris scores
    xpad_ref : (Pb, H+2, Wp+2)   replicate-ROW-padded input scratch
    prod_ref : (Pb, H+6, Wp)     shared reflect-ROW-padded product scratch
    hpad_ref : (Pb, H, Wp+6)     shared lane-padded horizontal-blur temp
    plane_w  : width of ONE original plane (lane-boundary period inside Wp)
    """
    Pb, H, Wp = out_ref.shape
    W = plane_w
    g0, g1, g2, g3 = GAUSS7[0], GAUSS7[1], GAUSS7[2], GAUSS7[3]

    # ---- per-plane lane-boundary masks (computed once, reused everywhere) ----
    col = jax.lax.broadcasted_iota(jnp.int32, (Pb, H, Wp), 2)
    if Wp == W:
        c = col
    elif (W & (W - 1)) == 0:              # packing only happens for W | 128
        c = jnp.bitwise_and(col, W - 1)
    else:
        c = col % W
    is_l = (c == 0, c == 1, c == 2)            # left boundary columns of a plane
    is_r = (c == W - 1, c == W - 2, c == W - 3)  # right boundary columns

    # ---- 1. replicate-ROW-padded input (lane halos are dead -> just zeroed) ----
    x = x_ref[...]
    xpad_ref[:, 1:H + 1, 1:Wp + 1] = x
    xpad_ref[:, 0:1, 1:Wp + 1] = x[:, 0:1, :]
    xpad_ref[:, H + 1:H + 2, 1:Wp + 1] = x[:, H - 1:H, :]
    xpad_ref[:, :, 0:1] = jnp.zeros((Pb, H + 2, 1), jnp.float32)
    xpad_ref[:, :, Wp + 1:Wp + 2] = jnp.zeros((Pb, H + 2, 1), jnp.float32)

    # ---- 2. normalized Sobel gradients (replicate border) --------------------
    # rows come from the row-padded scratch; lane-direction replicate at every
    # per-plane boundary is a select of the center column (no 1-lane stores).
    def xw(di, dj):
        return xpad_ref[:, di:di + H, dj:dj + Wp]

    t_c = xw(0, 1)
    m_c = x                                   # xw(1,1) == x, skip the reload
    b_c = xw(2, 1)
    t_l = jnp.where(is_l[0], t_c, xw(0, 0)); t_r = jnp.where(is_r[0], t_c, xw(0, 2))
    m_l = jnp.where(is_l[0], m_c, xw(1, 0)); m_r = jnp.where(is_r[0], m_c, xw(1, 2))
    b_l = jnp.where(is_l[0], b_c, xw(2, 0)); b_r = jnp.where(is_r[0], b_c, xw(2, 2))

    # kornia normalize_kernel2d: sobel / sum(|k|) = / 8
    dx = ((t_r - t_l) + 2.0 * (m_r - m_l) + (b_r - b_l)) * 0.125
    dy = ((b_l - t_l) + 2.0 * (b_c - t_c) + (b_r - t_r)) * 0.125

    # dead lane halo of the shared horizontal temp (never read after selects)
    hpad_ref[:, :, 0:3] = jnp.zeros((Pb, H, 3), jnp.float32)
    hpad_ref[:, :, Wp + 3:Wp + 6] = jnp.zeros((Pb, H, 3), jnp.float32)

    # ---- 3/4. separable 7x7 gaussian with reflect(3) border, per product ----
    def blur7(p):
        # (a) reflect-ROW pad + vertical (sublane) pass, symmetric taps
        prod_ref[:, 3:H + 3, :] = p
        for i in range(1, 4):
            prod_ref[:, 3 - i:4 - i, :] = prod_ref[:, 3 + i:4 + i, :]
            prod_ref[:, H + 2 + i:H + 3 + i, :] = prod_ref[:, H + 2 - i:H + 3 - i, :]
        vb = (g3 * p
              + g2 * (prod_ref[:, 2:2 + H, :] + prod_ref[:, 4:4 + H, :])
              + g1 * (prod_ref[:, 1:1 + H, :] + prod_ref[:, 5:5 + H, :])
              + g0 * (prod_ref[:, 0:0 + H, :] + prod_ref[:, 6:6 + H, :]))

        # (b) horizontal (lane) pass from ONE shared temp; per-plane reflect-3
        #     at packed plane boundaries via iota-mask selects between windows.
        hpad_ref[:, :, 3:3 + Wp] = vb
        win = {s: hpad_ref[:, :, 3 + s:3 + s + Wp] for s in (-3, -2, -1, 1, 2, 3)}
        win[0] = vb

        def fix_pos(t):      # window at +t; columns c >= W-t reflect in-plane
            v = win[t]
            for r in range(t):                      # c == W-1-r  ->  offset 2r-t
                v = jnp.where(is_r[r], win[2 * r - t], v)
            return v

        def fix_neg(t):      # window at -t; columns c < t reflect in-plane
            v = win[-t]
            for r in range(t):                      # c == r      ->  offset t-2r
                v = jnp.where(is_l[r], win[t - 2 * r], v)
            return v

        return (g3 * win[0]
                + g2 * (fix_neg(1) + fix_pos(1))
                + g1 * (fix_neg(2) + fix_pos(2))
                + g0 * (fix_neg(3) + fix_pos(3)))

    dx2b = blur7(dx * dx)
    dy2b = blur7(dy * dy)
    dxyb = blur7(dx * dy)

    # ---- 5. harris score ------------------------------------------------------
    det_m = dx2b * dy2b - dxyb * dxyb
    tr = dx2b + dy2b
    out_ref[...] = det_m - k * tr * tr


# --------------------------------- wrapper ---------------------------------- #
def _ru(x, m):
    return (x + m - 1) // m * m


def _pick_group(W):
    """How many planes to fold into the 128-lane axis (lane-dense packing)."""
    if 4 <= W < 128 and 128 % W == 0:
        return 128 // W
    return 1


def _vmem_plan(H, Wp, n_groups):
    """Pick groups-per-step (Pb) and an explicit vmem limit, tile-round aware."""
    try:
        cap = int(pltpu.get_tpu_info().vmem_capacity_bytes)
        cap = min(max(cap, 16 * 1024 * 1024), 256 * 1024 * 1024)
    except Exception:  # no TPU info available -> conservative (v7x-sized) default
        cap = 64 * 1024 * 1024
    vmem_limit = (cap * 3) // 4          # 96 MiB on v5e/v6e, 48 MiB on v7x
    budget = vmem_limit // 2             # what our accounted structures may use

    def tb(rows, cols):                  # f32 bytes after (8,128) tile rounding
        return 4 * _ru(max(rows, 1), 8) * _ru(max(cols, 1), 128)

    per_group = (
        4 * tb(H, Wp)                    # in + out blocks, double-buffered
        + tb(H + 2, Wp + 2)              # replicate-padded input scratch
        + tb(H + 6, Wp)                  # shared row-padded product scratch
        + tb(H, Wp + 6)                  # shared lane-padded blur temp
        + 16 * tb(H, Wp)                 # compiler temps: dx, dy, vb, 3 blurred,
                                         # tap windows, iota/masks, spills
    )
    pb = int(max(1, min(budget // per_group, n_groups, 32)))
    return pb, int(vmem_limit)


def harris_response_pallas(x, k=0.04, grads_mode="sobel", sigmas=None):
    if grads_mode != "sobel":
        # TODO(synk): grads_mode='diff' (Gaussian-pyramid differences) not implemented.
        raise NotImplementedError("only grads_mode='sobel' is implemented")
    B, C, H, W = x.shape
    if H < 4 or W < 4:
        raise ValueError("CornerHarris needs H >= 4 and W >= 4 (reflect pad 3)")
    BC = B * C
    planes = x.astype(jnp.float32).reshape(BC, H, W)

    # ---- lane-dense packing of planes into the 128-lane axis ----
    g = _pick_group(W)
    Wp = g * W
    n_groups = -(-BC // g)
    if n_groups * g != BC:
        planes = jnp.pad(planes, ((0, n_groups * g - BC), (0, 0), (0, 0)))
    if g > 1:
        packed = (planes.reshape(n_groups, g, H, W)
                  .transpose(0, 2, 1, 3)
                  .reshape(n_groups, H, Wp))
    else:
        packed = planes

    Pb, vmem_limit = _vmem_plan(H, Wp, n_groups)
    n_groups_pad = _ru(n_groups, Pb)
    if n_groups_pad != n_groups:
        packed = jnp.pad(packed, ((0, n_groups_pad - n_groups), (0, 0), (0, 0)))

    blk = pl.BlockSpec((Pb, H, Wp), lambda i: (i, 0, 0))
    scores_packed = pl.pallas_call(
        functools.partial(_harris_kernel, k=float(k), plane_w=W),
        out_shape=jax.ShapeDtypeStruct((n_groups_pad, H, Wp), jnp.float32),
        grid=(n_groups_pad // Pb,),
        in_specs=[blk],
        out_specs=blk,
        scratch_shapes=[
            pltpu.VMEM((Pb, H + 2, Wp + 2), jnp.float32),  # replicate-row-padded input
            pltpu.VMEM((Pb, H + 6, Wp), jnp.float32),      # shared row-padded product
            pltpu.VMEM((Pb, H, Wp + 6), jnp.float32),      # shared horizontal-blur temp
        ],
        compiler_params=pltpu.CompilerParams(
            dimension_semantics=("parallel",),
            vmem_limit_bytes=vmem_limit),
    )(packed)

    # ---- unpack lanes back to planes ----
    scores_packed = scores_packed[:n_groups]
    if g > 1:
        scores = (scores_packed.reshape(n_groups, H, g, W)
                  .transpose(0, 2, 1, 3)
                  .reshape(n_groups * g, H, W))
    else:
        scores = scores_packed
    scores = scores[:BC].reshape(B, C, H, W)

    if sigmas is not None:
        # spec: sigmas has shape (B,) and broadcasts over channels
        sig = jnp.asarray(sigmas, jnp.float32).reshape(B, 1, 1, 1)
        scores = scores * (sig ** 4)
    return scores


class CornerHarris:
    """JAX/Pallas port of kornia.feature.CornerHarris (grads_mode='sobel')."""

    def __init__(self, k, grads_mode="sobel"):
        self.k = float(k)
        self.grads_mode = grads_mode

    def __call__(self, x, sigmas=None):
        return harris_response_pallas(x, self.k, self.grads_mode, sigmas)


# ----------------------------- pure-JAX reference --------------------------- #
def harris_response_ref(x, k=0.04, sigmas=None):
    B, C, H, W = x.shape
    planes = x.astype(jnp.float32).reshape(B * C, H, W)
    xp = jnp.pad(planes, ((0, 0), (1, 1), (1, 1)), mode="edge")
    kx = jnp.array([[-1, 0, 1], [-2, 0, 2], [-1, 0, 1]], jnp.float32) / 8.0
    ky = kx.T

    def corr3(xpad, ker):
        out = jnp.zeros((planes.shape[0], H, W), jnp.float32)
        for i in range(3):
            for j in range(3):
                out = out + ker[i, j] * xpad[:, i:i + H, j:j + W]
        return out

    dx = corr3(xp, kx)
    dy = corr3(xp, ky)

    g = jnp.array(GAUSS7, jnp.float32)
    k2d = jnp.outer(g, g)

    def blur(a):
        ap = jnp.pad(a, ((0, 0), (3, 3), (3, 3)), mode="reflect")
        out = jnp.zeros_like(a)
        for i in range(7):
            for j in range(7):
                out = out + k2d[i, j] * ap[:, i:i + H, j:j + W]
        return out

    dx2 = blur(dx * dx)
    dy2 = blur(dy * dy)
    dxy = blur(dx * dy)
    det_m = dx2 * dy2 - dxy * dxy
    trace_m = dx2 + dy2
    scores = (det_m - k * trace_m * trace_m).reshape(B, C, H, W)
    if sigmas is not None:
        sig = jnp.asarray(sigmas, jnp.float32).reshape(B, 1, 1, 1)
        scores = scores * (sig ** 4)
    return scores


# ----------------------------------- main ----------------------------------- #
if __name__ == "__main__":
    key = jax.random.PRNGKey(0)
    x = jax.random.normal(key, (2, 4, 16, 16), dtype=jnp.float32)

    module = CornerHarris(k=0.04, grads_mode="sobel")
    out = jax.block_until_ready(module(x))
    assert out.shape == (2, 4, 16, 16)
    ref = harris_response_ref(x, k=0.04)
    np.testing.assert_allclose(np.asarray(out), np.asarray(ref), rtol=1e-5, atol=2e-6)

    # also exercise the un-packed (g == 1) path with a lane-aligned width
    x2 = jax.random.normal(jax.random.PRNGKey(0), (1, 2, 16, 128), dtype=jnp.float32)
    out2 = jax.block_until_ready(module(x2))
    ref2 = harris_response_ref(x2, k=0.04)
    np.testing.assert_allclose(np.asarray(out2), np.asarray(ref2), rtol=1e-5, atol=2e-6)

    print("KERNEL_OK")
</pallas_src>

<mosaic_0001>
module attributes {stable_mosaic.version = 11 : i64} {
  func.func @_harris_kernel(%arg0: i32, %arg1: memref<1x16x128xf32, #tpu.memory_space<vmem>>, %arg2: memref<1x16x128xf32, #tpu.memory_space<vmem>>, %arg3: memref<1x18x130xf32, #tpu.memory_space<vmem>>, %arg4: memref<1x22x128xf32, #tpu.memory_space<vmem>>, %arg5: memref<1x16x134xf32, #tpu.memory_space<vmem>>) attributes {dimension_semantics = [#tpu.dimension_semantics<parallel>], iteration_bounds = array<i64: 1>, scalar_prefetch = 0 : i64, scratch_operands = 3 : i64, tpu.core_type = #tpu.core_type<tc>, window_params = [{transform_indices = @transform_0, window_bounds = array<i64: 1, 16, 128>}, {transform_indices = @transform_1, window_bounds = array<i64: 1, 16, 128>}]} {
    %0 = tpu.iota {dimensions = array<i32: 2>} : vector<1x16x128xi32>
    %c15_i32 = arith.constant 15 : i32
    %1 = vector.broadcast %c15_i32 : i32 to vector<1x16x128xi32>
    %2 = arith.andi %0, %1 : vector<1x16x128xi32>
    %c0_i32 = arith.constant 0 : i32
    %3 = vector.broadcast %c0_i32 : i32 to vector<1x16x128xi32>
    %4 = arith.cmpi eq, %2, %3 : vector<1x16x128xi32>
    %c1_i32 = arith.constant 1 : i32
    %5 = vector.broadcast %c1_i32 : i32 to vector<1x16x128xi32>
    %6 = arith.cmpi eq, %2, %5 : vector<1x16x128xi32>
    %c2_i32 = arith.constant 2 : i32
    %7 = vector.broadcast %c2_i32 : i32 to vector<1x16x128xi32>
    %8 = arith.cmpi eq, %2, %7 : vector<1x16x128xi32>
    %c15_i32_0 = arith.constant 15 : i32
    %9 = vector.broadcast %c15_i32_0 : i32 to vector<1x16x128xi32>
    %10 = arith.cmpi eq, %2, %9 : vector<1x16x128xi32>
    %c14_i32 = arith.constant 14 : i32
    %11 = vector.broadcast %c14_i32 : i32 to vector<1x16x128xi32>
    %12 = arith.cmpi eq, %2, %11 : vector<1x16x128xi32>
    %c13_i32 = arith.constant 13 : i32
    %13 = vector.broadcast %c13_i32 : i32 to vector<1x16x128xi32>
    %14 = arith.cmpi eq, %2, %13 : vector<1x16x128xi32>
    %c0 = arith.constant 0 : index
    %c0_1 = arith.constant 0 : index
    %c0_2 = arith.constant 0 : index
    %15 = vector.load %arg1[%c0, %c0_1, %c0_2] : memref<1x16x128xf32, #tpu.memory_space<vmem>>, vector<1x16x128xf32>
    %c0_3 = arith.constant 0 : index
    %c1 = arith.constant 1 : index
    %c1_4 = arith.constant 1 : index
    %16 = vector.load %arg3[%c0_3, %c1, %c1_4] : memref<1x18x130xf32, #tpu.memory_space<vmem>>, vector<1x16x128xf32>
    tpu.vector_store %arg3[%c0_3, %c1, %c1_4], %15 {strides = array<i32>} : memref<1x18x130xf32, #tpu.memory_space<vmem>>, vector<1x16x128xf32>,
    %17 = vector.extract_strided_slice %15 {offsets = [0, 0, 0], sizes = [1, 1, 128], strides = [1, 1, 1]} : vector<1x16x128xf32> to vector<1x1x128xf32>
    %c0_5 = arith.constant 0 : index
    %c0_6 = arith.constant 0 : index
    %c1_7 = arith.constant 1 : index
    %18 = vector.load %arg3[%c0_5, %c0_6, %c1_7] : memref<1x18x130xf32, #tpu.memory_space<vmem>>, vector<1x1x128xf32>
    tpu.vector_store %arg3[%c0_5, %c0_6, %c1_7], %17 {strides = array<i32>} : memref<1x18x130xf32, #tpu.memory_space<vmem>>, vector<1x1x128xf32>,
    %19 = vector.extract_strided_slice %15 {offsets = [0, 15, 0], sizes = [1, 1, 128], strides = [1, 1, 1]} : vector<1x16x128xf32> to vector<1x1x128xf32>
    %c0_8 = arith.constant 0 : index
    %c17 = arith.constant 17 : index
    %c1_9 = arith.constant 1 : index
    %20 = vector.load %arg3[%c0_8, %c17, %c1_9] : memref<1x18x130xf32, #tpu.memory_space<vmem>>, vector<1x1x128xf32>
    tpu.vector_store %arg3[%c0_8, %c17, %c1_9], %19 {strides = array<i32>} : memref<1x18x130xf32, #tpu.memory_space<vmem>>, vector<1x1x128xf32>,
    %cst = arith.constant 0.000000e+00 : f32
    %21 = vector.broadcast %cst : f32 to vector<1x18x1xf32>
    %c0_10 = arith.constant 0 : index
    %c0_11 = arith.constant 0 : index
    %c0_12 = arith.constant 0 : index
    %22 = vector.load %arg3[%c0_10, %c0_11, %c0_12] : memref<1x18x130xf32, #tpu.memory_space<vmem>>, vector<1x18x1xf32>
    tpu.vector_store %arg3[%c0_10, %c0_11, %c0_12], %21 {strides = array<i32>} : memref<1x18x130xf32, #tpu.memory_space<vmem>>, vector<1x18x1xf32>,
    %cst_13 = arith.constant 0.000000e+00 : f32
    %23 = vector.broadcast %cst_13 : f32 to vector<1x18x1xf32>
    %c0_14 = arith.constant 0 : index
    %c0_15 = arith.constant 0 : index
    %c129 = arith.constant 129 : index
    %24 = vector.load %arg3[%c0_14, %c0_15, %c129] : memref<1x18x130xf32, #tpu.memory_space<vmem>>, vector<1x18x1xf32>
    tpu.vector_store %arg3[%c0_14, %c0_15, %c129], %23 {strides = array<i32>} : memref<1x18x130xf32, #tpu.memory_space<vmem>>, vector<1x18x1xf32>,
    %c0_16 = arith.constant 0 : index
    %c0_17 = arith.constant 0 : index
    %c1_18 = arith.constant 1 : index
    %25 = vector.load %arg3[%c0_16, %c0_17, %c1_18] : memref<1x18x130xf32, #tpu.memory_space<vmem>>, vector<1x16x128xf32>
    %c0_19 = arith.constant 0 : index
    %c2 = arith.constant 2 : index
    %c1_20 = arith.constant 1 : index
    %26 = vector.load %arg3[%c0_19, %c2, %c1_20] : memref<1x18x130xf32, #tpu.memory_space<vmem>>, vector<1x16x128xf32>
    %c0_21 = arith.constant 0 : index
    %c0_22 = arith.constant 0 : index
    %c0_23 = arith.constant 0 : index
    %27 = vector.load %arg3[%c0_21, %c0_22, %c0_23] : memref<1x18x130xf32, #tpu.memory_space<vmem>>, vector<1x16x128xf32>
    %28 = arith.select %4, %25, %27 : vector<1x16x128xi1>, vector<1x16x128xf32>
    %c0_24 = arith.constant 0 : index
    %c0_25 = arith.constant 0 : index
    %c2_26 = arith.constant 2 : index
    %29 = vector.load %arg3[%c0_24, %c0_25, %c2_26] : memref<1x18x130xf32, #tpu.memory_space<vmem>>, vector<1x16x128xf32>
    %30 = arith.select %10, %25, %29 : vector<1x16x128xi1>, vector<1x16x128xf32>
    %c0_27 = arith.constant 0 : index
    %c1_28 = arith.constant 1 : index
    %c0_29 = arith.constant 0 : index
    %31 = vector.load %arg3[%c0_27, %c1_28, %c0_29] : memref<1x18x130xf32, #tpu.memory_space<vmem>>, vector<1x16x128xf32>
    %32 = arith.select %4, %15, %31 : vector<1x16x128xi1>, vector<1x16x128xf32>
    %c0_30 = arith.constant 0 : index
    %c1_31 = arith.constant 1 : index
    %c2_32 = arith.constant 2 : index
    %33 = vector.load %arg3[%c0_30, %c1_31, %c2_32] : memref<1x18x130xf32, #tpu.memory_space<vmem>>, vector<1x16x128xf32>
    %34 = arith.select %10, %15, %33 : vector<1x16x128xi1>, vector<1x16x128xf32>
    %c0_33 = arith.constant 0 : index
    %c2_34 = arith.constant 2 : index
    %c0_35 = arith.constant 0 : index
    %35 = vector.load %arg3[%c0_33, %c2_34, %c0_35] : memref<1x18x130xf32, #tpu.memory_space<vmem>>, vector<1x16x128xf32>
    %36 = arith.select %4, %26, %35 : vector<1x16x128xi1>, vector<1x16x128xf32>
    %c0_36 = arith.constant 0 : index
    %c2_37 = arith.constant 2 : index
    %c2_38 = arith.constant 2 : index
    %37 = vector.load %arg3[%c0_36, %c2_37, %c2_38] : memref<1x18x130xf32, #tpu.memory_space<vmem>>, vector<1x16x128xf32>
    %38 = arith.select %10, %26, %37 : vector<1x16x128xi1>, vector<1x16x128xf32>
    %39 = arith.subf %30, %28 : vector<1x16x128xf32>
    %40 = arith.subf %34, %32 : vector<1x16x128xf32>
    %cst_39 = arith.constant 2.000000e+00 : f32
    %41 = vector.broadcast %cst_39 : f32 to vector<1x16x128xf32>
    %42 = arith.mulf %41, %40 : vector<1x16x128xf32>
    %43 = arith.addf %39, %42 : vector<1x16x128xf32>
    %44 = arith.subf %38, %36 : vector<1x16x128xf32>
    %45 = arith.addf %43, %44 : vector<1x16x128xf32>
    %cst_40 = arith.constant 1.250000e-01 : f32
    %46 = vector.broadcast %cst_40 : f32 to vector<1x16x128xf32>
    %47 = arith.mulf %45, %46 : vector<1x16x128xf32>
    %48 = arith.subf %36, %28 : vector<1x16x128xf32>
    %49 = arith.subf %26, %25 : vector<1x16x128xf32>
    %cst_41 = arith.constant 2.000000e+00 : f32
    %50 = vector.broadcast %cst_41 : f32 to vector<1x16x128xf32>
    %51 = arith.mulf %50, %49 : vector<1x16x128xf32>
    %52 = arith.addf %48, %51 : vector<1x16x128xf32>
    %53 = arith.subf %38, %30 : vector<1x16x128xf32>
    %54 = arith.addf %52, %53 : vector<1x16x128xf32>
    %cst_42 = arith.constant 1.250000e-01 : f32
    %55 = vector.broadcast %cst_42 : f32 to vector<1x16x128xf32>
    %56 = arith.mulf %54, %55 : vector<1x16x128xf32>
    %cst_43 = arith.constant 0.000000e+00 : f32
    %57 = vector.broadcast %cst_43 : f32 to vector<1x16x3xf32>
    %c0_44 = arith.constant 0 : index
    %c0_45 = arith.constant 0 : index
    %c0_46 = arith.constant 0 : index
    %58 = vector.load %arg5[%c0_44, %c0_45, %c0_46] : memref<1x16x134xf32, #tpu.memory_space<vmem>>, vector<1x16x3xf32>
    tpu.vector_store %arg5[%c0_44, %c0_45, %c0_46], %57 {strides = array<i32>} : memref<1x16x134xf32, #tpu.memory_space<vmem>>, vector<1x16x3xf32>,
    %cst_47 = arith.constant 0.000000e+00 : f32
    %59 = vector.broadcast %cst_47 : f32 to vector<1x16x3xf32>
    %c0_48 = arith.constant 0 : index
    %c0_49 = arith.constant 0 : index
    %c131 = arith.constant 131 : index
    %60 = vector.load %arg5[%c0_48, %c0_49, %c131] : memref<1x16x134xf32, #tpu.memory_space<vmem>>, vector<1x16x3xf32>
    tpu.vector_store %arg5[%c0_48, %c0_49, %c131], %59 {strides = array<i32>} : memref<1x16x134xf32, #tpu.memory_space<vmem>>, vector<1x16x3xf32>,
    %61 = arith.mulf %47, %47 : vector<1x16x128xf32>
    %c0_50 = arith.constant 0 : index
    %c3 = arith.constant 3 : index
    %c0_51 = arith.constant 0 : index
    %62 = vector.load %arg4[%c0_50, %c3, %c0_51] : memref<1x22x128xf32, #tpu.memory_space<vmem>>, vector<1x16x128xf32>
    tpu.vector_store %arg4[%c0_50, %c3, %c0_51], %61 {strides = array<i32>} : memref<1x22x128xf32, #tpu.memory_space<vmem>>, vector<1x16x128xf32>,
    %c0_52 = arith.constant 0 : index
    %c4 = arith.constant 4 : index
    %c0_53 = arith.constant 0 : index
    %63 = vector.load %arg4[%c0_52, %c4, %c0_53] : memref<1x22x128xf32, #tpu.memory_space<vmem>>, vector<1x1x128xf32>
    %c0_54 = arith.constant 0 : index
    %c2_55 = arith.constant 2 : index
    %c0_56 = arith.constant 0 : index
    %64 = vector.load %arg4[%c0_54, %c2_55, %c0_56] : memref<1x22x128xf32, #tpu.memory_space<vmem>>, vector<1x1x128xf32>
    tpu.vector_store %arg4[%c0_54, %c2_55, %c0_56], %63 {strides = array<i32>} : memref<1x22x128xf32, #tpu.memory_space<vmem>>, vector<1x1x128xf32>,
    %c0_57 = arith.constant 0 : index
    %c17_58 = arith.constant 17 : index
    %c0_59 = arith.constant 0 : index
    %65 = vector.load %arg4[%c0_57, %c17_58, %c0_59] : memref<1x22x128xf32, #tpu.memory_space<vmem>>, vector<1x1x128xf32>
    %c0_60 = arith.constant 0 : index
    %c19 = arith.constant 19 : index
    %c0_61 = arith.constant 0 : index
    %66 = vector.load %arg4[%c0_60, %c19, %c0_61] : memref<1x22x128xf32, #tpu.memory_space<vmem>>, vector<1x1x128xf32>
    tpu.vector_store %arg4[%c0_60, %c19, %c0_61], %65 {strides = array<i32>} : memref<1x22x128xf32, #tpu.memory_space<vmem>>, vector<1x1x128xf32>,
    %c0_62 = arith.constant 0 : index
    %c5 = arith.constant 5 : index
    %c0_63 = arith.constant 0 : index
    %67 = vector.load %arg4[%c0_62, %c5, %c0_63] : memref<1x22x128xf32, #tpu.memory_space<vmem>>, vector<1x1x128xf32>
    %c0_64 = arith.constant 0 : index
    %c1_65 = arith.constant 1 : index
    %c0_66 = arith.constant 0 : index
    %68 = vector.load %arg4[%c0_64, %c1_65, %c0_66] : memref<1x22x128xf32, #tpu.memory_space<vmem>>, vector<1x1x128xf32>
    tpu.vector_store %arg4[%c0_64, %c1_65, %c0_66], %67 {strides = array<i32>} : memref<1x22x128xf32, #tpu.memory_space<vmem>>, vector<1x1x128xf32>,
    %c0_67 = arith.constant 0 : index
    %c16 = arith.constant 16 : index
    %c0_68 = arith.constant 0 : index
    %69 = vector.load %arg4[%c0_67, %c16, %c0_68] : memref<1x22x128xf32, #tpu.memory_space<vmem>>, vector<1x1x128xf32>
    %c0_69 = arith.constant 0 : index
    %c20 = arith.constant 20 : index
    %c0_70 = arith.constant 0 : index
    %70 = vector.load %arg4[%c0_69, %c20, %c0_70] : memref<1x22x128xf32, #tpu.memory_space<vmem>>, vector<1x1x128xf32>
    tpu.vector_store %arg4[%c0_69, %c20, %c0_70], %69 {strides = array<i32>} : memref<1x22x128xf32, #tpu.memory_space<vmem>>, vector<1x1x128xf32>,
    %c0_71 = arith.constant 0 : index
    %c6 = arith.constant 6 : index
    %c0_72 = arith.constant 0 : index
    %71 = vector.load %arg4[%c0_71, %c6, %c0_72] : memref<1x22x128xf32, #tpu.memory_space<vmem>>, vector<1x1x128xf32>
    %c0_73 = arith.constant 0 : index
    %c0_74 = arith.constant 0 : index
    %c0_75 = arith.constant 0 : index
    %72 = vector.load %arg4[%c0_73, %c0_74, %c0_75] : memref<1x22x128xf32, #tpu.memory_space<vmem>>, vector<1x1x128xf32>
    tpu.vector_store %arg4[%c0_73, %c0_74, %c0_75], %71 {strides = array<i32>} : memref<1x22x128xf32, #tpu.memory_space<vmem>>, vector<1x1x128xf32>,
    %c0_76 = arith.constant 0 : index
    %c15 = arith.constant 15 : index
    %c0_77 = arith.constant 0 : index
    %73 = vector.load %arg4[%c0_76, %c15, %c0_77] : memref<1x22x128xf32, #tpu.memory_space<vmem>>, vector<1x1x128xf32>
    %c0_78 = arith.constant 0 : index
    %c21 = arith.constant 21 : index
    %c0_79 = arith.constant 0 : index
    %74 = vector.load %arg4[%c0_78, %c21, %c0_79] : memref<1x22x128xf32, #tpu.memory_space<vmem>>, vector<1x1x128xf32>
    tpu.vector_store %arg4[%c0_78, %c21, %c0_79], %73 {strides = array<i32>} : memref<1x22x128xf32, #tpu.memory_space<vmem>>, vector<1x1x128xf32>,
    %cst_80 = arith.constant 0.399050266 : f32
    %75 = vector.broadcast %cst_80 : f32 to vector<1x16x128xf32>
    %76 = arith.mulf %75, %61 : vector<1x16x128xf32>
    %c0_81 = arith.constant 0 : index
    %c2_82 = arith.constant 2 : index
    %c0_83 = arith.constant 0 : index
    %77 = vector.load %arg4[%c0_81, %c2_82, %c0_83] : memref<1x22x128xf32, #tpu.memory_space<vmem>>, vector<1x16x128xf32>
    %c0_84 = arith.constant 0 : index
    %c4_85 = arith.constant 4 : index
    %c0_86 = arith.constant 0 : index
    %78 = vector.load %arg4[%c0_84, %c4_85, %c0_86] : memref<1x22x128xf32, #tpu.memory_space<vmem>>, vector<1x16x128xf32>
    %79 = arith.addf %77, %78 : vector<1x16x128xf32>
    %cst_87 = arith.constant 0.242036223 : f32
    %80 = vector.broadcast %cst_87 : f32 to vector<1x16x128xf32>
    %81 = arith.mulf %80, %79 : vector<1x16x128xf32>
    %82 = arith.addf %76, %81 : vector<1x16x128xf32>
    %c0_88 = arith.constant 0 : index
    %c1_89 = arith.constant 1 : index
    %c0_90 = arith.constant 0 : index
    %83 = vector.load %arg4[%c0_88, %c1_89, %c0_90] : memref<1x22x128xf32, #tpu.memory_space<vmem>>, vector<1x16x128xf32>
    %c0_91 = arith.constant 0 : index
    %c5_92 = arith.constant 5 : index
    %c0_93 = arith.constant 0 : index
    %84 = vector.load %arg4[%c0_91, %c5_92, %c0_93] : memref<1x22x128xf32, #tpu.memory_space<vmem>>, vector<1x16x128xf32>
    %85 = arith.addf %83, %84 : vector<1x16x128xf32>
    %cst_94 = arith.constant 0.0540055819 : f32
    %86 = vector.broadcast %cst_94 : f32 to vector<1x16x128xf32>
    %87 = arith.mulf %86, %85 : vector<1x16x128xf32>
    %88 = arith.addf %82, %87 : vector<1x16x128xf32>
    %c0_95 = arith.constant 0 : index
    %c0_96 = arith.constant 0 : index
    %c0_97 = arith.constant 0 : index
    %89 = vector.load %arg4[%c0_95, %c0_96, %c0_97] : memref<1x22x128xf32, #tpu.memory_space<vmem>>, vector<1x16x128xf32>
    %c0_98 = arith.constant 0 : index
    %c6_99 = arith.constant 6 : index
    %c0_100 = arith.constant 0 : index
    %90 = vector.load %arg4[%c0_98, %c6_99, %c0_100] : memref<1x22x128xf32, #tpu.memory_space<vmem>>, vector<1x16x128xf32>
    %91 = arith.addf %89, %90 : vector<1x16x128xf32>
    %cst_101 = arith.constant 0.00443304796 : f32
    %92 = vector.broadcast %cst_101 : f32 to vector<1x16x128xf32>
    %93 = arith.mulf %92, %91 : vector<1x16x128xf32>
    %94 = arith.addf %88, %93 : vector<1x16x128xf32>
    %c0_102 = arith.constant 0 : index
    %c0_103 = arith.constant 0 : index
    %c3_104 = arith.constant 3 : index
    %95 = vector.load %arg5[%c0_102, %c0_103, %c3_104] : memref<1x16x134xf32, #tpu.memory_space<vmem>>, vector<1x16x128xf32>
    tpu.vector_store %arg5[%c0_102, %c0_103, %c3_104], %94 {strides = array<i32>} : memref<1x16x134xf32, #tpu.memory_space<vmem>>, vector<1x16x128xf32>,
    %c0_105 = arith.constant 0 : index
    %c0_106 = arith.constant 0 : index
    %c0_107 = arith.constant 0 : index
    %96 = vector.load %arg5[%c0_105, %c0_106, %c0_107] : memref<1x16x134xf32, #tpu.memory_space<vmem>>, vector<1x16x128xf32>
    %c0_108 = arith.constant 0 : index
    %c0_109 = arith.constant 0 : index
    %c1_110 = arith.constant 1 : index
    %97 = vector.load %arg5[%c0_108, %c0_109, %c1_110] : memref<1x16x134xf32, #tpu.memory_space<vmem>>, vector<1x16x128xf32>
    %c0_111 = arith.constant 0 : index
    %c0_112 = arith.constant 0 : index
    %c2_113 = arith.constant 2 : index
    %98 = vector.load %arg5[%c0_111, %c0_112, %c2_113] : memref<1x16x134xf32, #tpu.memory_space<vmem>>, vector<1x16x128xf32>
    %c0_114 = arith.constant 0 : index
    %c0_115 = arith.constant 0 : index
    %c4_116 = arith.constant 4 : index
    %99 = vector.load %arg5[%c0_114, %c0_115, %c4_116] : memref<1x16x134xf32, #tpu.memory_space<vmem>>, vector<1x16x128xf32>
    %c0_117 = arith.constant 0 : index
    %c0_118 = arith.constant 0 : index
    %c5_119 = arith.constant 5 : index
    %100 = vector.load %arg5[%c0_117, %c0_118, %c5_119] : memref<1x16x134xf32, #tpu.memory_space<vmem>>, vector<1x16x128xf32>
    %c0_120 = arith.constant 0 : index
    %c0_121 = arith.constant 0 : index
    %c6_122 = arith.constant 6 : index
    %101 = vector.load %arg5[%c0_120, %c0_121, %c6_122] : memref<1x16x134xf32, #tpu.memory_space<vmem>>, vector<1x16x128xf32>
    %cst_123 = arith.constant 0.399050266 : f32
    %102 = vector.broadcast %cst_123 : f32 to vector<1x16x128xf32>
    %103 = arith.mulf %102, %94 : vector<1x16x128xf32>
    %104 = arith.select %4, %99, %98 : vector<1x16x128xi1>, vector<1x16x128xf32>
    %105 = arith.select %10, %98, %99 : vector<1x16x128xi1>, vector<1x16x128xf32>
    %106 = arith.addf %104, %105 : vector<1x16x128xf32>
    %cst_124 = arith.constant 0.242036223 : f32
    %107 = vector.broadcast %cst_124 : f32 to vector<1x16x128xf32>
    %108 = arith.mulf %107, %106 : vector<1x16x128xf32>
    %109 = arith.addf %103, %108 : vector<1x16x128xf32>
    %110 = arith.select %4, %100, %97 : vector<1x16x128xi1>, vector<1x16x128xf32>
    %111 = arith.select %6, %94, %110 : vector<1x16x128xi1>, vector<1x16x128xf32>
    %112 = arith.select %10, %97, %100 : vector<1x16x128xi1>, vector<1x16x128xf32>
    %113 = arith.select %12, %94, %112 : vector<1x16x128xi1>, vector<1x16x128xf32>
    %114 = arith.addf %111, %113 : vector<1x16x128xf32>
    %cst_125 = arith.constant 0.0540055819 : f32
    %115 = vector.broadcast %cst_125 : f32 to vector<1x16x128xf32>
    %116 = arith.mulf %115, %114 : vector<1x16x128xf32>
    %117 = arith.addf %109, %116 : vector<1x16x128xf32>
    %118 = arith.select %4, %101, %96 : vector<1x16x128xi1>, vector<1x16x128xf32>
    %119 = arith.select %6, %99, %118 : vector<1x16x128xi1>, vector<1x16x128xf32>
    %120 = arith.select %8, %98, %119 : vector<1x16x128xi1>, vector<1x16x128xf32>
    %121 = arith.select %10, %96, %101 : vector<1x16x128xi1>, vector<1x16x128xf32>
    %122 = arith.select %12, %98, %121 : vector<1x16x128xi1>, vector<1x16x128xf32>
    %123 = arith.select %14, %99, %122 : vector<1x16x128xi1>, vector<1x16x128xf32>
    %124 = arith.addf %120, %123 : vector<1x16x128xf32>
    %cst_126 = arith.constant 0.00443304796 : f32
    %125 = vector.broadcast %cst_126 : f32 to vector<1x16x128xf32>
    %126 = arith.mulf %125, %124 : vector<1x16x128xf32>
    %127 = arith.addf %117, %126 : vector<1x16x128xf32>
    %128 = arith.mulf %56, %56 : vector<1x16x128xf32>
    %c0_127 = arith.constant 0 : index
    %c3_128 = arith.constant 3 : index
    %c0_129 = arith.constant 0 : index
    %129 = vector.load %arg4[%c0_127, %c3_128, %c0_129] : memref<1x22x128xf32, #tpu.memory_space<vmem>>, vector<1x16x128xf32>
    tpu.vector_store %arg4[%c0_127, %c3_128, %c0_129], %128 {strides = array<i32>} : memref<1x22x128xf32, #tpu.memory_space<vmem>>, vector<1x16x128xf32>,
    %c0_130 = arith.constant 0 : index
    %c4_131 = arith.constant 4 : index
    %c0_132 = arith.constant 0 : index
    %130 = vector.load %arg4[%c0_130, %c4_131, %c0_132] : memref<1x22x128xf32, #tpu.memory_space<vmem>>, vector<1x1x128xf32>
    %c0_133 = arith.constant 0 : index
    %c2_134 = arith.constant 2 : index
    %c0_135 = arith.constant 0 : index
    %131 = vector.load %arg4[%c0_133, %c2_134, %c0_135] : memref<1x22x128xf32, #tpu.memory_space<vmem>>, vector<1x1x128xf32>
    tpu.vector_store %arg4[%c0_133, %c2_134, %c0_135], %130 {strides = array<i32>} : memref<1x22x128xf32, #tpu.memory_space<vmem>>, vector<1x1x128xf32>,
    %c0_136 = arith.constant 0 : index
    %c17_137 = arith.constant 17 : index
    %c0_138 = arith.constant 0 : index
    %132 = vector.load %arg4[%c0_136, %c17_137, %c0_138] : memref<1x22x128xf32, #tpu.memory_space<vmem>>, vector<1x1x128xf32>
    %c0_139 = arith.constant 0 : index
    %c19_140 = arith.constant 19 : index
    %c0_141 = arith.constant 0 : index
    %133 = vector.load %arg4[%c0_139, %c19_140, %c0_141] : memref<1x22x128xf32, #tpu.memory_space<vmem>>, vector<1x1x128xf32>
    tpu.vector_store %arg4[%c0_139, %c19_140, %c0_141], %132 {strides = array<i32>} : memref<1x22x128xf32, #tpu.memory_space<vmem>>, vector<1x1x128xf32>,
    %c0_142 = arith.constant 0 : index
    %c5_143 = arith.constant 5 : index
    %c0_144 = arith.constant 0 : index
    %134 = vector.load %arg4[%c0_142, %c5_143, %c0_144] : memref<1x22x128xf32, #tpu.memory_space<vmem>>, vector<1x1x128xf32>
    %c0_145 = arith.constant 0 : index
    %c1_146 = arith.constant 1 : index
    %c0_147 = arith.constant 0 : index
    %135 = vector.load %arg4[%c0_145, %c1_146, %c0_147] : memref<1x22x128xf32, #tpu.memory_space<vmem>>, vector<1x1x128xf32>
    tpu.vector_store %arg4[%c0_145, %c1_146, %c0_147], %134 {strides = array<i32>} : memref<1x22x128xf32, #tpu.memory_space<vmem>>, vector<1x1x128xf32>,
    %c0_148 = arith.constant 0 : index
    %c16_149 = arith.constant 16 : index
    %c0_150 = arith.constant 0 : index
    %136 = vector.load %arg4[%c0_148, %c16_149, %c0_150] : memref<1x22x128xf32, #tpu.memory_space<vmem>>, vector<1x1x128xf32>
    %c0_151 = arith.constant 0 : index
    %c20_152 = arith.constant 20 : index
    %c0_153 = arith.constant 0 : index
    %137 = vector.load %arg4[%c0_151, %c20_152, %c0_153] : memref<1x22x128xf32, #tpu.memory_space<vmem>>, vector<1x1x128xf32>
    tpu.vector_store %arg4[%c0_151, %c20_152, %c0_153], %136 {strides = array<i32>} : memref<1x22x128xf32, #tpu.memory_space<vmem>>, vector<1x1x128xf32>,
    %c0_154 = arith.constant 0 : index
    %c6_155 = arith.constant 6 : index
    %c0_156 = arith.constant 0 : index
    %138 = vector.load %arg4[%c0_154, %c6_155, %c0_156] : memref<1x22x128xf32, #tpu.memory_space<vmem>>, vector<1x1x128xf32>
    %c0_157 = arith.constant 0 : index
    %c0_158 = arith.constant 0 : index
    %c0_159 = arith.constant 0 : index
    %139 = vector.load %arg4[%c0_157, %c0_158, %c0_159] : memref<1x22x128xf32, #tpu.memory_space<vmem>>, vector<1x1x128xf32>
    tpu.vector_store %arg4[%c0_157, %c0_158, %c0_159], %138 {strides = array<i32>} : memref<1x22x128xf32, #tpu.memory_space<vmem>>, vector<1x1x128xf32>,
    %c0_160 = arith.constant 0 : index
    %c15_161 = arith.constant 15 : index
    %c0_162 = arith.constant 0 : index
    %140 = vector.load %arg4[%c0_160, %c15_161, %c0_162] : memref<1x22x128xf32, #tpu.memory_space<vmem>>, vector<1x1x128xf32>
    %c0_163 = arith.constant 0 : index
    %c21_164 = arith.constant 21 : index
    %c0_165 = arith.constant 0 : index
    %141 = vector.load %arg4[%c0_163, %c21_164, %c0_165] : memref<1x22x128xf32, #tpu.memory_space<vmem>>, vector<1x1x128xf32>
    tpu.vector_store %arg4[%c0_163, %c21_164, %c0_165], %140 {strides = array<i32>} : memref<1x22x128xf32, #tpu.memory_space<vmem>>, vector<1x1x128xf32>,
    %cst_166 = arith.constant 0.399050266 : f32
    %142 = vector.broadcast %cst_166 : f32 to vector<1x16x128xf32>
    %143 = arith.mulf %142, %128 : vector<1x16x128xf32>
    %c0_167 = arith.constant 0 : index
    %c2_168 = arith.constant 2 : index
    %c0_169 = arith.constant 0 : index
    %144 = vector.load %arg4[%c0_167, %c2_168, %c0_169] : memref<1x22x128xf32, #tpu.memory_space<vmem>>, vector<1x16x128xf32>
    %c0_170 = arith.constant 0 : index
    %c4_171 = arith.constant 4 : index
    %c0_172 = arith.constant 0 : index
    %145 = vector.load %arg4[%c0_170, %c4_171, %c0_172] : memref<1x22x128xf32, #tpu.memory_space<vmem>>, vector<1x16x128xf32>
    %146 = arith.addf %144, %145 : vector<1x16x128xf32>
    %cst_173 = arith.constant 0.242036223 : f32
    %147 = vector.broadcast %cst_173 : f32 to vector<1x16x128xf32>
    %148 = arith.mulf %147, %146 : vector<1x16x128xf32>
    %149 = arith.addf %143, %148 : vector<1x16x128xf32>
    %c0_174 = arith.constant 0 : index
    %c1_175 = arith.constant 1 : index
    %c0_176 = arith.constant 0 : index
    %150 = vector.load %arg4[%c0_174, %c1_175, %c0_176] : memref<1x22x128xf32, #tpu.memory_space<vmem>>, vector<1x16x128xf32>
    %c0_177 = arith.constant 0 : index
    %c5_178 = arith.constant 5 : index
    %c0_179 = arith.constant 0 : index
    %151 = vector.load %arg4[%c0_177, %c5_178, %c0_179] : memref<1x22x128xf32, #tpu.memory_space<vmem>>, vector<1x16x128xf32>
    %152 = arith.addf %150, %151 : vector<1x16x128xf32>
    %cst_180 = arith.constant 0.0540055819 : f32
    %153 = vector.broadcast %cst_180 : f32 to vector<1x16x128xf32>
    %154 = arith.mulf %153, %152 : vector<1x16x128xf32>
    %155 = arith.addf %149, %154 : vector<1x16x128xf32>
    %c0_181 = arith.constant 0 : index
    %c0_182 = arith.constant 0 : index
    %c0_183 = arith.constant 0 : index
    %156 = vector.load %arg4[%c0_181, %c0_182, %c0_183] : memref<1x22x128xf32, #tpu.memory_space<vmem>>, vector<1x16x128xf32>
    %c0_184 = arith.constant 0 : index
    %c6_185 = arith.constant 6 : index
    %c0_186 = arith.constant 0 : index
    %157 = vector.load %arg4[%c0_184, %c6_185, %c0_186] : memref<1x22x128xf32, #tpu.memory_space<vmem>>, vector<1x16x128xf32>
    %158 = arith.addf %156, %157 : vector<1x16x128xf32>
    %cst_187 = arith.constant 0.00443304796 : f32
    %159 = vector.broadcast %cst_187 : f32 to vector<1x16x128xf32>
    %160 = arith.mulf %159, %158 : vector<1x16x128xf32>
    %161 = arith.addf %155, %160 : vector<1x16x128xf32>
    %c0_188 = arith.constant 0 : index
    %c0_189 = arith.constant 0 : index
    %c3_190 = arith.constant 3 : index
    %162 = vector.load %arg5[%c0_188, %c0_189, %c3_190] : memref<1x16x134xf32, #tpu.memory_space<vmem>>, vector<1x16x128xf32>
    tpu.vector_store %arg5[%c0_188, %c0_189, %c3_190], %161 {strides = array<i32>} : memref<1x16x134xf32, #tpu.memory_space<vmem>>, vector<1x16x128xf32>,
    %c0_191 = arith.constant 0 : index
    %c0_192 = arith.constant 0 : index
    %c0_193 = arith.constant 0 : index
    %163 = vector.load %arg5[%c0_191, %c0_192, %c0_193] : memref<1x16x134xf32, #tpu.memory_space<vmem>>, vector<1x16x128xf32>
    %c0_194 = arith.constant 0 : index
    %c0_195 = arith.constant 0 : index
    %c1_196 = arith.constant 1 : index
    %164 = vector.load %arg5[%c0_194, %c0_195, %c1_196] : memref<1x16x134xf32, #tpu.memory_space<vmem>>, vector<1x16x128xf32>
    %c0_197 = arith.constant 0 : index
    %c0_198 = arith.constant 0 : index
    %c2_199 = arith.constant 2 : index
    %165 = vector.load %arg5[%c0_197, %c0_198, %c2_199] : memref<1x16x134xf32, #tpu.memory_space<vmem>>, vector<1x16x128xf32>
    %c0_200 = arith.constant 0 : index
    %c0_201 = arith.constant 0 : index
    %c4_202 = arith.constant 4 : index
    %166 = vector.load %arg5[%c0_200, %c0_201, %c4_202] : memref<1x16x134xf32, #tpu.memory_space<vmem>>, vector<1x16x128xf32>
    %c0_203 = arith.constant 0 : index
    %c0_204 = arith.constant 0 : index
    %c5_205 = arith.constant 5 : index
    %167 = vector.load %arg5[%c0_203, %c0_204, %c5_205] : memref<1x16x134xf32, #tpu.memory_space<vmem>>, vector<1x16x128xf32>
    %c0_206 = arith.constant 0 : index
    %c0_207 = arith.constant 0 : index
    %c6_208 = arith.constant 6 : index
    %168 = vector.load %arg5[%c0_206, %c0_207, %c6_208] : memref<1x16x134xf32, #tpu.memory_space<vmem>>, vector<1x16x128xf32>
    %cst_209 = arith.constant 0.399050266 : f32
    %169 = vector.broadcast %cst_209 : f32 to vector<1x16x128xf32>
    %170 = arith.mulf %169, %161 : vector<1x16x128xf32>
    %171 = arith.select %4, %166, %165 : vector<1x16x128xi1>, vector<1x16x128xf32>
    %172 = arith.select %10, %165, %166 : vector<1x16x128xi1>, vector<1x16x128xf32>
    %173 = arith.addf %171, %172 : vector<1x16x128xf32>
    %cst_210 = arith.constant 0.242036223 : f32
    %174 = vector.broadcast %cst_210 : f32 to vector<1x16x128xf32>
    %175 = arith.mulf %174, %173 : vector<1x16x128xf32>
    %176 = arith.addf %170, %175 : vector<1x16x128xf32>
    %177 = arith.select %4, %167, %164 : vector<1x16x128xi1>, vector<1x16x128xf32>
    %178 = arith.select %6, %161, %177 : vector<1x16x128xi1>, vector<1x16x128xf32>
    %179 = arith.select %10, %164, %167 : vector<1x16x128xi1>, vector<1x16x128xf32>
    %180 = arith.select %12, %161, %179 : vector<1x16x128xi1>, vector<1x16x128xf32>
    %181 = arith.addf %178, %180 : vector<1x16x128xf32>
    %cst_211 = arith.constant 0.0540055819 : f32
    %182 = vector.broadcast %cst_211 : f32 to vector<1x16x128xf32>
    %183 = arith.mulf %182, %181 : vector<1x16x128xf32>
    %184 = arith.addf %176, %183 : vector<1x16x128xf32>
    %185 = arith.select %4, %168, %163 : vector<1x16x128xi1>, vector<1x16x128xf32>
    %186 = arith.select %6, %166, %185 : vector<1x16x128xi1>, vector<1x16x128xf32>
    %187 = arith.select %8, %165, %186 : vector<1x16x128xi1>, vector<1x16x128xf32>
    %188 = arith.select %10, %163, %168 : vector<1x16x128xi1>, vector<1x16x128xf32>
    %189 = arith.select %12, %165, %188 : vector<1x16x128xi1>, vector<1x16x128xf32>
    %190 = arith.select %14, %166, %189 : vector<1x16x128xi1>, vector<1x16x128xf32>
    %191 = arith.addf %187, %190 : vector<1x16x128xf32>
    %cst_212 = arith.constant 0.00443304796 : f32
    %192 = vector.broadcast %cst_212 : f32 to vector<1x16x128xf32>
    %193 = arith.mulf %192, %191 : vector<1x16x128xf32>
    %194 = arith.addf %184, %193 : vector<1x16x128xf32>
    %195 = arith.mulf %47, %56 : vector<1x16x128xf32>
    %c0_213 = arith.constant 0 : index
    %c3_214 = arith.constant 3 : index
    %c0_215 = arith.constant 0 : index
    %196 = vector.load %arg4[%c0_213, %c3_214, %c0_215] : memref<1x22x128xf32, #tpu.memory_space<vmem>>, vector<1x16x128xf32>
    tpu.vector_store %arg4[%c0_213, %c3_214, %c0_215], %195 {strides = array<i32>} : memref<1x22x128xf32, #tpu.memory_space<vmem>>, vector<1x16x128xf32>,
    %c0_216 = arith.constant 0 : index
    %c4_217 = arith.constant 4 : index
    %c0_218 = arith.constant 0 : index
    %197 = vector.load %arg4[%c0_216, %c4_217, %c0_218] : memref<1x22x128xf32, #tpu.memory_space<vmem>>, vector<1x1x128xf32>
    %c0_219 = arith.constant 0 : index
    %c2_220 = arith.constant 2 : index
    %c0_221 = arith.constant 0 : index
    %198 = vector.load %arg4[%c0_219, %c2_220, %c0_221] : memref<1x22x128xf32, #tpu.memory_space<vmem>>, vector<1x1x128xf32>
    tpu.vector_store %arg4[%c0_219, %c2_220, %c0_221], %197 {strides = array<i32>} : memref<1x22x128xf32, #tpu.memory_space<vmem>>, vector<1x1x128xf32>,
    %c0_222 = arith.constant 0 : index
    %c17_223 = arith.constant 17 : index
    %c0_224 = arith.constant 0 : index
    %199 = vector.load %arg4[%c0_222, %c17_223, %c0_224] : memref<1x22x128xf32, #tpu.memory_space<vmem>>, vector<1x1x128xf32>
    %c0_225 = arith.constant 0 : index
    %c19_226 = arith.constant 19 : index
    %c0_227 = arith.constant 0 : index
    %200 = vector.load %arg4[%c0_225, %c19_226, %c0_227] : memref<1x22x128xf32, #tpu.memory_space<vmem>>, vector<1x1x128xf32>
    tpu.vector_store %arg4[%c0_225, %c19_226, %c0_227], %199 {strides = array<i32>} : memref<1x22x128xf32, #tpu.memory_space<vmem>>, vector<1x1x128xf32>,
    %c0_228 = arith.constant 0 : index
    %c5_229 = arith.constant 5 : index
    %c0_230 = arith.constant 0 : index
    %201 = vector.load %arg4[%c0_228, %c5_229, %c0_230] : memref<1x22x128xf32, #tpu.memory_space<vmem>>, vector<1x1x128xf32>
    %c0_231 = arith.constant 0 : index
    %c1_232 = arith.constant 1 : index
    %c0_233 = arith.constant 0 : index
    %202 = vector.load %arg4[%c0_231, %c1_232, %c0_233] : memref<1x22x128xf32, #tpu.memory_space<vmem>>, vector<1x1x128xf32>
    tpu.vector_store %arg4[%c0_231, %c1_232, %c0_233], %201 {strides = array<i32>} : memref<1x22x128xf32, #tpu.memory_space<vmem>>, vector<1x1x128xf32>,
    %c0_234 = arith.constant 0 : index
    %c16_235 = arith.constant 16 : index
    %c0_236 = arith.constant 0 : index
    %203 = vector.load %arg4[%c0_234, %c16_235, %c0_236] : memref<1x22x128xf32, #tpu.memory_space<vmem>>, vector<1x1x128xf32>
    %c0_237 = arith.constant 0 : index
    %c20_238 = arith.constant 20 : index
    %c0_239 = arith.constant 0 : index
    %204 = vector.load %arg4[%c0_237, %c20_238, %c0_239] : memref<1x22x128xf32, #tpu.memory_space<vmem>>, vector<1x1x128xf32>
    tpu.vector_store %arg4[%c0_237, %c20_238, %c0_239], %203 {strides = array<i32>} : memref<1x22x128xf32, #tpu.memory_space<vmem>>, vector<1x1x128xf32>,
    %c0_240 = arith.constant 0 : index
    %c6_241 = arith.constant 6 : index
    %c0_242 = arith.constant 0 : index
    %205 = vector.load %arg4[%c0_240, %c6_241, %c0_242] : memref<1x22x128xf32, #tpu.memory_space<vmem>>, vector<1x1x128xf32>
    %c0_243 = arith.constant 0 : index
    %c0_244 = arith.constant 0 : index
    %c0_245 = arith.constant 0 : index
    %206 = vector.load %arg4[%c0_243, %c0_244, %c0_245] : memref<1x22x128xf32, #tpu.memory_space<vmem>>, vector<1x1x128xf32>
    tpu.vector_store %arg4[%c0_243, %c0_244, %c0_245], %205 {strides = array<i32>} : memref<1x22x128xf32, #tpu.memory_space<vmem>>, vector<1x1x128xf32>,
    %c0_246 = arith.constant 0 : index
    %c15_247 = arith.constant 15 : index
    %c0_248 = arith.constant 0 : index
    %207 = vector.load %arg4[%c0_246, %c15_247, %c0_248] : memref<1x22x128xf32, #tpu.memory_space<vmem>>, vector<1x1x128xf32>
    %c0_249 = arith.constant 0 : index
    %c21_250 = arith.constant 21 : index
    %c0_251 = arith.constant 0 : index
    %208 = vector.load %arg4[%c0_249, %c21_250, %c0_251] : memref<1x22x128xf32, #tpu.memory_space<vmem>>, vector<1x1x128xf32>
    tpu.vector_store %arg4[%c0_249, %c21_250, %c0_251], %207 {strides = array<i32>} : memref<1x22x128xf32, #tpu.memory_space<vmem>>, vector<1x1x128xf32>,
    %cst_252 = arith.constant 0.399050266 : f32
    %209 = vector.broadcast %cst_252 : f32 to vector<1x16x128xf32>
    %210 = arith.mulf %209, %195 : vector<1x16x128xf32>
    %c0_253 = arith.constant 0 : index
    %c2_254 = arith.constant 2 : index
    %c0_255 = arith.constant 0 : index
    %211 = vector.load %arg4[%c0_253, %c2_254, %c0_255] : memref<1x22x128xf32, #tpu.memory_space<vmem>>, vector<1x16x128xf32>
    %c0_256 = arith.constant 0 : index
    %c4_257 = arith.constant 4 : index
    %c0_258 = arith.constant 0 : index
    %212 = vector.load %arg4[%c0_256, %c4_257, %c0_258] : memref<1x22x128xf32, #tpu.memory_space<vmem>>, vector<1x16x128xf32>
    %213 = arith.addf %211, %212 : vector<1x16x128xf32>
    %cst_259 = arith.constant 0.242036223 : f32
    %214 = vector.broadcast %cst_259 : f32 to vector<1x16x128xf32>
    %215 = arith.mulf %214, %213 : vector<1x16x128xf32>
    %216 = arith.addf %210, %215 : vector<1x16x128xf32>
    %c0_260 = arith.constant 0 : index
    %c1_261 = arith.constant 1 : index
    %c0_262 = arith.constant 0 : index
    %217 = vector.load %arg4[%c0_260, %c1_261, %c0_262] : memref<1x22x128xf32, #tpu.memory_space<vmem>>, vector<1x16x128xf32>
    %c0_263 = arith.constant 0 : index
    %c5_264 = arith.constant 5 : index
    %c0_265 = arith.constant 0 : index
    %218 = vector.load %arg4[%c0_263, %c5_264, %c0_265] : memref<1x22x128xf32, #tpu.memory_space<vmem>>, vector<1x16x128xf32>
    %219 = arith.addf %217, %218 : vector<1x16x128xf32>
    %cst_266 = arith.constant 0.0540055819 : f32
    %220 = vector.broadcast %cst_266 : f32 to vector<1x16x128xf32>
    %221 = arith.mulf %220, %219 : vector<1x16x128xf32>
    %222 = arith.addf %216, %221 : vector<1x16x128xf32>
    %c0_267 = arith.constant 0 : index
    %c0_268 = arith.constant 0 : index
    %c0_269 = arith.constant 0 : index
    %223 = vector.load %arg4[%c0_267, %c0_268, %c0_269] : memref<1x22x128xf32, #tpu.memory_space<vmem>>, vector<1x16x128xf32>
    %c0_270 = arith.constant 0 : index
    %c6_271 = arith.constant 6 : index
    %c0_272 = arith.constant 0 : index
    %224 = vector.load %arg4[%c0_270, %c6_271, %c0_272] : memref<1x22x128xf32, #tpu.memory_space<vmem>>, vector<1x16x128xf32>
    %225 = arith.addf %223, %224 : vector<1x16x128xf32>
    %cst_273 = arith.constant 0.00443304796 : f32
    %226 = vector.broadcast %cst_273 : f32 to vector<1x16x128xf32>
    %227 = arith.mulf %226, %225 : vector<1x16x128xf32>
    %228 = arith.addf %222, %227 : vector<1x16x128xf32>
    %c0_274 = arith.constant 0 : index
    %c0_275 = arith.constant 0 : index
    %c3_276 = arith.constant 3 : index
    %229 = vector.load %arg5[%c0_274, %c0_275, %c3_276] : memref<1x16x134xf32, #tpu.memory_space<vmem>>, vector<1x16x128xf32>
    tpu.vector_store %arg5[%c0_274, %c0_275, %c3_276], %228 {strides = array<i32>} : memref<1x16x134xf32, #tpu.memory_space<vmem>>, vector<1x16x128xf32>,
    %c0_277 = arith.constant 0 : index
    %c0_278 = arith.constant 0 : index
    %c0_279 = arith.constant 0 : index
    %230 = vector.load %arg5[%c0_277, %c0_278, %c0_279] : memref<1x16x134xf32, #tpu.memory_space<vmem>>, vector<1x16x128xf32>
    %c0_280 = arith.constant 0 : index
    %c0_281 = arith.constant 0 : index
    %c1_282 = arith.constant 1 : index
    %231 = vector.load %arg5[%c0_280, %c0_281, %c1_282] : memref<1x16x134xf32, #tpu.memory_space<vmem>>, vector<1x16x128xf32>
    %c0_283 = arith.constant 0 : index
    %c0_284 = arith.constant 0 : index
    %c2_285 = arith.constant 2 : index
    %232 = vector.load %arg5[%c0_283, %c0_284, %c2_285] : memref<1x16x134xf32, #tpu.memory_space<vmem>>, vector<1x16x128xf32>
    %c0_286 = arith.constant 0 : index
    %c0_287 = arith.constant 0 : index
    %c4_288 = arith.constant 4 : index
    %233 = vector.load %arg5[%c0_286, %c0_287, %c4_288] : memref<1x16x134xf32, #tpu.memory_space<vmem>>, vector<1x16x128xf32>
    %c0_289 = arith.constant 0 : index
    %c0_290 = arith.constant 0 : index
    %c5_291 = arith.constant 5 : index
    %234 = vector.load %arg5[%c0_289, %c0_290, %c5_291] : memref<1x16x134xf32, #tpu.memory_space<vmem>>, vector<1x16x128xf32>
    %c0_292 = arith.constant 0 : index
    %c0_293 = arith.constant 0 : index
    %c6_294 = arith.constant 6 : index
    %235 = vector.load %arg5[%c0_292, %c0_293, %c6_294] : memref<1x16x134xf32, #tpu.memory_space<vmem>>, vector<1x16x128xf32>
    %cst_295 = arith.constant 0.399050266 : f32
    %236 = vector.broadcast %cst_295 : f32 to vector<1x16x128xf32>
    %237 = arith.mulf %236, %228 : vector<1x16x128xf32>
    %238 = arith.select %4, %233, %232 : vector<1x16x128xi1>, vector<1x16x128xf32>
    %239 = arith.select %10, %232, %233 : vector<1x16x128xi1>, vector<1x16x128xf32>
    %240 = arith.addf %238, %239 : vector<1x16x128xf32>
    %cst_296 = arith.constant 0.242036223 : f32
    %241 = vector.broadcast %cst_296 : f32 to vector<1x16x128xf32>
    %242 = arith.mulf %241, %240 : vector<1x16x128xf32>
    %243 = arith.addf %237, %242 : vector<1x16x128xf32>
    %244 = arith.select %4, %234, %231 : vector<1x16x128xi1>, vector<1x16x128xf32>
    %245 = arith.select %6, %228, %244 : vector<1x16x128xi1>, vector<1x16x128xf32>
    %246 = arith.select %10, %231, %234 : vector<1x16x128xi1>, vector<1x16x128xf32>
    %247 = arith.select %12, %228, %246 : vector<1x16x128xi1>, vector<1x16x128xf32>
    %248 = arith.addf %245, %247 : vector<1x16x128xf32>
    %cst_297 = arith.constant 0.0540055819 : f32
    %249 = vector.broadcast %cst_297 : f32 to vector<1x16x128xf32>
    %250 = arith.mulf %249, %248 : vector<1x16x128xf32>
    %251 = arith.addf %243, %250 : vector<1x16x128xf32>
    %252 = arith.select %4, %235, %230 : vector<1x16x128xi1>, vector<1x16x128xf32>
    %253 = arith.select %6, %233, %252 : vector<1x16x128xi1>, vector<1x16x128xf32>
    %254 = arith.select %8, %232, %253 : vector<1x16x128xi1>, vector<1x16x128xf32>
    %255 = arith.select %10, %230, %235 : vector<1x16x128xi1>, vector<1x16x128xf32>
    %256 = arith.select %12, %232, %255 : vector<1x16x128xi1>, vector<1x16x128xf32>
    %257 = arith.select %14, %233, %256 : vector<1x16x128xi1>, vector<1x16x128xf32>
    %258 = arith.addf %254, %257 : vector<1x16x128xf32>
    %cst_298 = arith.constant 0.00443304796 : f32
    %259 = vector.broadcast %cst_298 : f32 to vector<1x16x128xf32>
    %260 = arith.mulf %259, %258 : vector<1x16x128xf32>
    %261 = arith.addf %251, %260 : vector<1x16x128xf32>
    %262 = arith.mulf %127, %194 : vector<1x16x128xf32>
    %263 = arith.mulf %261, %261 : vector<1x16x128xf32>
    %264 = arith.subf %262, %263 : vector<1x16x128xf32>
    %265 = arith.addf %127, %194 : vector<1x16x128xf32>
    %cst_299 = arith.constant 4.000000e-02 : f32
    %266 = vector.broadcast %cst_299 : f32 to vector<1x16x128xf32>
    %267 = arith.mulf %266, %265 : vector<1x16x128xf32>
    %268 = arith.mulf %267, %265 : vector<1x16x128xf32>
    %269 = arith.subf %264, %268 : vector<1x16x128xf32>
    %c0_300 = arith.constant 0 : index
    %c0_301 = arith.constant 0 : index
    %c0_302 = arith.constant 0 : index
    %270 = vector.load %arg2[%c0_300, %c0_301, %c0_302] : memref<1x16x128xf32, #tpu.memory_space<vmem>>, vector<1x16x128xf32>
    tpu.vector_store %arg2[%c0_300, %c0_301, %c0_302], %269 {strides = array<i32>} : memref<1x16x128xf32, #tpu.memory_space<vmem>>, vector<1x16x128xf32>,
    return
  }
  func.func @transform_0(%arg0: i32) -> (i32, i32, i32) {
    %c0_i32 = arith.constant 0 : i32
    %c0_i32_0 = arith.constant 0 : i32
    %c0_i32_1 = arith.constant 0 : i32
    return %arg0, %c0_i32, %c0_i32_0 : i32, i32, i32
  }
  func.func @transform_1(%arg0: i32) -> (i32, i32, i32) {
    %c0_i32 = arith.constant 0 : i32
    %c0_i32_0 = arith.constant 0 : i32
    %c0_i32_1 = arith.constant 0 : i32
    return %arg0, %c0_i32, %c0_i32_0 : i32, i32, i32
  }
}

</mosaic_0001>

<bundles_post_ra>
// kernel: tpu_custom_call.1
= control target key start
LH: loop header
LB: loop body
LE: loop exit
PB: predicated region body
PF: predicated region fallthrough
CT: control target
= control target key end

     0   :  { %6 = vsyncpa [#allocation6], 0  ;;  %s1483_s0 = inlined_call_operand.hbm [shape: f32[1,16,128], index: 0, kind: input, shape index: {}]   ;;  %s1484_s1 = inlined_call_operand.hbm [shape: f32[1,16,128], index: 1, kind: output, shape index: {}]  }
   0x1   :  { %7 = vsyncpa [#allocation7], 0  ;;  %s897_s6 = smov [#allocation5]   ;;  %s849_s10 = scalar_lea.hbm %s1483_s0, 256 }
   0x2   :  { %s13_s7 = sshll.u32 %s897_s6, 4  ;;  %p850_p0 = scmp.ne.s32.totalorder %s1483_s0, %s849_s10  ;;  %s14_s7 = int_to_ptr.vmem [resolvable:$true] %s13_s7 }
   0x3   :  { %p853_p1 = scmp.lt.u32.totalorder %s849_s10, %s1483_s0 }
   0x5   :  { %p855_p2 = pnand %p853_p1, %p850_p0 }
   0x7   :  { %858 = shalt.err (!%p855_p2)
}
   0x8   :  { %s859_s15 = scalar_lea.vmem %s14_s7, 256  ;;  %p864_p4 = scmp.lt.s32.totalorder %s14_s7, %s14_s7 }
   0x9   :  { %p860_p3 = scmp.ne.s32.totalorder %s14_s7, %s859_s15  ;;  %p865_p5 = scmp.lt.s32.totalorder %s859_s15, %s859_s15 }
   0xb   :  { %p866_p6 = por %p865_p5, %p864_p4 }
   0xd   :  { %p867_p7 = pnand %p866_p6, %p860_p3 }
   0xf   :  { %870 = shalt.err (!%p867_p7)
}
  0x10   :  { %s898_s16 = smov 128   ;;  %s899_s17 = smov 8  }
  0x11   :  { %19 = dma.hbm_to_vmem [thread:$0]  %s1483_s0, 256, %s14_s7, [#allocation6], %s898_s16, %s898_s16, %s899_s17  }
  0x12   :  { %893 = dma.done.wait [#allocation6], 256  }
  0x13   :  { %894 = vsyncadd [#allocation6], 4294967040  ;;  %v934_v0 = vld [vmem:[#allocation5 + $0x8] sm:$0xff]  ;;  %v936_v1 = vld [vmem:[#allocation5] sm:$0xff]  ;;  %vm36_vm0 = vcmask 1040384   ;;  %s900_s20 = smov 1  }
  0x14   :  { %v38_v2 = vrot.slane %v934_v0, 7  ;;  %v37_v3 = vrot.slane %v936_v1, 7  ;;  %vm57_vm1 = vcmask 1040392   ;;  %vm59_vm2 = vcmask 0   ;;  %s902_s0 = smov 127   ;;  %s903_s21 = smov 126  }
  0x15   :  { %vm49_vm3 = vcmask 1047561   ;;  %vm51_vm4 = vcmask 7169   ;;  %vm70_vm5 = vcmask 1024   ;;  %vm75_vm6 = vcmask 9224   ;;  %s904_s22 = smov 3   ;;  %s905_s23 = smov 124  }
  0x16   :  { %44 = vrot.lane.b32.xlu1 %v38_v2, %s900_s20  ;;  %40 = vrot.lane.b32.xlu0 %v37_v3, %s900_s20  ;;  %v39_v4 = vsel %vm36_vm0, %v37_v3, %v38_v2  ;;  %v901_v7 = vmov 0.0   ;;  %vm53_vm7 = vcmask 1047560   ;;  %vm72_vm8 = vcmask 15368   ;;  %s906_s24 = smov 123   ;;  %s907_s25 = smov 122  }
  0x17   :  { %vm55_vm9 = vcmask 7168   ;;  %vm123_vm10 = vcmask 1046528   ;;  %vm160_vm11 = vcmask 1045504   ;;  %vm217_vm12 = vcmask 1041408   ;;  %s908_s26 = smov [#allocation8]  }
  0x18   :  { %vm278_vm13 = vcmask 23552   ;;  %vm281_vm14 = vcmask 48152   ;;  %vm112_vm15 = vcmask 1031168   ;;  %s825_s27 = sshll.u32 %s908_s26, 4  ;;  %s826_s27 = int_to_ptr.vmem [resolvable:$true] %s825_s27 }
  0x19   :  { %279 = vst.msk [vmem:[#allocation4] sm:$0xff] %vm278_vm13, %v901_v7  ;;  %280 = vst.msk [vmem:[#allocation4 + $0x10] sm:$0xff] %vm278_vm13, %v901_v7  ;;  %s871_s28 = scalar_lea.vmem %s826_s27, 256  ;;  %p876_p9 = scmp.lt.s32.totalorder %s826_s27, %s826_s27 }
  0x1a   :  { %61 = vrot.lane.b32.xlu1 %v936_v1, %s900_s20  ;;  %42 = vrot.lane.b32.xlu0 %v39_v4, %s900_s20  ;;  %282 = vst.msk [vmem:[#allocation4 + $0x8] sm:$0xff] %vm281_vm14, %v901_v7  ;;  %283 = vst.msk [vmem:[#allocation4 + $0x18] sm:$0xff] %vm281_vm14, %v901_v7  ;;  %p872_p8 = scmp.ne.s32.totalorder %s826_s27, %s871_s28  ;;  %p877_p10 = scmp.lt.s32.totalorder %s871_s28, %s871_s28 }
  0x1c   :  { %p878_p11 = por %p877_p10, %p876_p9 }
  0x1e   :  { %p879_p12 = pnand %p878_p11, %p872_p8 }
  0x88   :  { %v45_v5 = vpop.permute.xlu1 %44  ;;  %v41_v6 = vpop.permute.xlu0 %40 }
  0x89   :  { %58 = vst.msk [vmem:[#allocation2 + $0x20] sm:$0x1] %vm57_vm1, %v45_v5  ;;  %66 = vst.msk [vmem:[#allocation2 + $0x21] sm:$0x1] %vm57_vm1, %v45_v5 }
  0x8a   :  { %60 = vst.msk [vmem:[#allocation2 + $0x28] sm:$0x1] %vm59_vm2, %v45_v5  ;;  %67 = vst.msk [vmem:[#allocation2 + $0x29] sm:$0x1] %vm59_vm2, %v45_v5 }
  0x8b   :  { %50 = vst.msk [vmem:[#allocation2] sm:$0xfe] %vm49_vm3, %v41_v6  ;;  %vm340_vm3 = vcmask 1047576  }
  0x8c   :  { %52 = vst.msk [vmem:[#allocation2 + $0x8] sm:$0xfe] %vm51_vm4, %v41_v6  ;;  %v62_v8 = vpop.permute.xlu1 %61  ;;  %v43_v9 = vpop.permute.xlu0 %42  ;;  %vm363_vm4 = vcmask 1014784  }
  0x8d   :  { %71 = vst.msk [vmem:[#allocation2 + $0x20] sm:$0x3] %vm70_vm5, %v901_v7  ;;  %vm398_vm5 = vcmask 1006592  }
  0x8e   :  { %76 = vst.msk [vmem:[#allocation2 + $0x28] sm:$0x3] %vm75_vm6, %v901_v7 }
  0x8f   :  { %64 = vst.msk [vmem:[#allocation2] sm:$0x1] %vm57_vm1, %v62_v8 }
  0x90   :  { %65 = vst.msk [vmem:[#allocation2 + $0x8] sm:$0x1] %vm59_vm2, %v62_v8  ;;  %vm97_vm2 = vcmask 1039360  }
  0x91   :  { %54 = vst.msk [vmem:[#allocation2 + $0x10] sm:$0xff] %vm53_vm7, %v43_v9 }
  0x92   :  { %56 = vst.msk [vmem:[#allocation2 + $0x18] sm:$0xff] %vm55_vm9, %v43_v9  ;;  %68 = vst.msk [vmem:[#allocation2] sm:$0xff] %vm55_vm9, %v901_v7 }
  0x93   :  { %73 = vst.msk [vmem:[#allocation2 + $0x8] sm:$0xff] %vm72_vm8, %v901_v7  ;;  %74 = vst.msk [vmem:[#allocation2 + $0x18] sm:$0xff] %vm72_vm8, %v901_v7  ;;  %vm437_vm8 = vcmask 998400  }
  0x94   :  { %69 = vst.msk [vmem:[#allocation2 + $0x10] sm:$0xff] %vm55_vm9, %v901_v7  ;;  %v120_v21 = vld [vmem:[#allocation2 + $0x20] sm:$0x1] }
  0x95   :  { %v134_v20 = vld [vmem:[#allocation2 + $0x28] sm:$0x1]  ;;  %v127_v26 = vrot.slane %v120_v21, 1  ;;  %v83_v37 = vld [vmem:[#allocation2 + $0x20] sm:$0x3] }
  0x96   :  { %v140_v25 = vrot.slane %v134_v20, 1  ;;  %v84_v34 = vld [vmem:[#allocation2 + $0x28] sm:$0x3]  ;;  %v167_v43 = vrot.slane %v83_v37, 2 }
  0x97   :  { %v169_v42 = vrot.slane %v84_v34, 2 }
  0x99   :  { %v953_v11 = vld [vmem:[#allocation2] sm:$0xff] }
  0x9a   :  { %v78_v10 = vld [vmem:[#allocation2 + $0x8] sm:$0xff]  ;;  %89 = vrot.lane.b32.xlu0 %v953_v11, %s902_s0  ;;  %v80_v12 = vld [vmem:[#allocation2 + $0x18] sm:$0xff]  ;;  %v119_v15 = vld [vmem:[#allocation2] sm:$0xfe]  ;;  %v218_v36 = vrot.slane %v953_v11, 6 }
  0x9b   :  { %91 = vrot.lane.b32.xlu1 %v78_v10, %s902_s0  ;;  %v961_v13 = vld [vmem:[#allocation2 + $0x10] sm:$0xff]  ;;  %v133_v14 = vld [vmem:[#allocation2 + $0x8] sm:$0xfe]  ;;  %v138_v17 = vrot.slane %v80_v12, 1  ;;  %v124_v18 = vrot.slane %v119_v15, 1  ;;  %v165_v29 = vrot.slane %v80_v12, 2 }
  0x9c   :  { %v137_v16 = vrot.slane %v133_v14, 1  ;;  %v125_v19 = vrot.slane %v961_v13, 1  ;;  %v82_v22 = vld [vmem:[#allocation2 + $0x8] sm:$0xfc]  ;;  %v81_v27 = vld [vmem:[#allocation2] sm:$0xfc] }
  0x9d   :  { %v164_v28 = vrot.slane %v82_v22, 2  ;;  %v141_v30 = vsel %vm123_vm10, %v138_v17, %v140_v25  ;;  %v161_v32 = vrot.slane %v81_v27, 2  ;;  %v162_v33 = vrot.slane %v961_v13, 2 }
  0x9e   :  { %104 = vrot.lane.b32.xlu0 %v953_v11, %s903_s21  ;;  %v139_v23 = vsel %vm123_vm10, %v137_v16, %v138_v17  ;;  %v972_v24 = vsel %vm123_vm10, %v124_v18, %v125_v19  ;;  %v979_v31 = vsel %vm123_vm10, %v125_v19, %v127_v26  ;;  %v219_v35 = vrot.slane %v78_v10, 6 }
  0x9f   :  { %106 = vrot.lane.b32.xlu1 %v78_v10, %s903_s21  ;;  %v222_v38 = vrot.slane %v80_v12, 6  ;;  %v220_v39 = vrot.slane %v961_v13, 6  ;;  %v166_v40 = vsel %vm160_vm11, %v164_v28, %v165_v29  ;;  %v989_v41 = vsel %vm160_vm11, %v161_v32, %v162_v33 }
  0xa0   :  { %v231_v46 = vsub.f32 %v82_v22, %v219_v35  ;;  %v230_v47 = vsub.f32 %v81_v27, %v218_v36  ;;  %v170_v48 = vsel %vm160_vm11, %v165_v29, %v169_v42  ;;  %v996_v49 = vsel %vm160_vm11, %v162_v33, %v167_v43 }
  0xa1   :  { %v223_v44 = vsel %vm217_vm12, %v219_v35, %v222_v38  ;;  %v221_v45 = vsel %vm217_vm12, %v218_v36, %v220_v39  ;;  %v235_v56 = vsub.f32 %v84_v34, %v222_v38  ;;  %v234_v57 = vsub.f32 %v83_v37, %v220_v39 }
  0xa2   :  { %93 = vrot.lane.b32.xlu0 %v961_v13, %s902_s0  ;;  %v233_v50 = vsub.f32 %v80_v12, %v223_v44  ;;  %v232_v51 = vsub.f32 %v961_v13, %v221_v45  ;;  %v237_v52 = vmul.f32 2.0, %v231_v46  ;;  %v236_v53 = vmul.f32 2.0, %v230_v47 }
  0xa3   :  { %95 = vrot.lane.b32.xlu1 %v80_v12, %s902_s0  ;;  %v241_v62 = vmul.f32 2.0, %v235_v56  ;;  %v240_v63 = vmul.f32 2.0, %v234_v57  ;;  %v23_v17 = vlaneseq }
  0xa4   :  { %v239_v54 = vmul.f32 2.0, %v233_v50  ;;  %v238_v55 = vmul.f32 2.0, %v232_v51  ;;  %v251_v58 = vrot.slane %v237_v52, 2  ;;  %v248_v59 = vrot.slane %v236_v53, 2 }
  0xa5   :  { %v256_v4 = vrot.slane %v241_v62, 2  ;;  %v254_v5 = vrot.slane %v240_v63, 2  ;;  %v24_v20 = vand.u32 127, %v23_v17 }
  0xa6   :  { %108 = vrot.lane.b32.xlu0 %v961_v13, %s903_s21  ;;  %v252_v60 = vrot.slane %v239_v54, 2  ;;  %v249_v61 = vrot.slane %v238_v55, 2 }
  0xa7   :  { %110 = vrot.lane.b32.xlu1 %v80_v12, %s903_s21 }
  0xa8   :  { %v253_v2 = vsel %vm160_vm11, %v251_v58, %v252_v60  ;;  %v250_v3 = vsel %vm160_vm11, %v248_v59, %v249_v61  ;;  %v257_v6 = vsel %vm160_vm11, %v252_v60, %v256_v4  ;;  %v255_v8 = vsel %vm160_vm11, %v249_v61, %v254_v5 }
  0xaa   :  { %142 = vrot.lane.b32.xlu0 %v972_v24, %s903_s21 }
  0xab   :  { %144 = vrot.lane.b32.xlu1 %v139_v23, %s903_s21  ;;  %v1022_v23 = vand.u32 15, %v24_v20 }
  0xad   :  { %vm26_vm0 = vcmp.eq.s32.totalorder %v1022_v23, 0  ;;  %vm29_vm1 = vcmp.eq.s32.totalorder %v1022_v23, 15  ;;  %vm27_vm6 = vcmp.eq.s32.totalorder %v1022_v23, 1  ;;  %vm30_vm7 = vcmp.eq.s32.totalorder %v1022_v23, 14 }
  0xae   :  { %146 = vrot.lane.b32.xlu0 %v979_v31, %s903_s21  ;;  %v131_v7 = vsel %vm26_vm0, %v936_v1, %v972_v24  ;;  %v132_v35 = vsel %vm26_vm0, %v934_v0, %v979_v31  ;;  %vm28_vm9 = vcmp.eq.s32.totalorder %v1022_v23, 2  ;;  %vm31_vm10 = vcmp.eq.s32.totalorder %v1022_v23, 13 }
  0xaf   :  { %148 = vrot.lane.b32.xlu1 %v141_v30, %s903_s21 }
  0xb2   :  { %171 = vrot.lane.b32.xlu0 %v989_v41, %s902_s0 }
  0xb3   :  { %173 = vrot.lane.b32.xlu1 %v166_v40, %s902_s0 }
  0xb6   :  { %175 = vrot.lane.b32.xlu0 %v996_v49, %s902_s0 }
  0xb7   :  { %177 = vrot.lane.b32.xlu1 %v170_v48, %s902_s0 }
  0xba   :  { %187 = vrot.lane.b32.xlu0 %v989_v41, %s903_s21 }
  0xbb   :  { %189 = vrot.lane.b32.xlu1 %v166_v40, %s903_s21 }
  0xbe   :  { %191 = vrot.lane.b32.xlu0 %v996_v49, %s903_s21 }
  0xbf   :  { %193 = vrot.lane.b32.xlu1 %v170_v48, %s903_s21 }
  0xc2   :  { %258 = vrot.lane.b32.xlu0 %v250_v3, %s902_s0 }
  0xc3   :  { %260 = vrot.lane.b32.xlu1 %v253_v2, %s902_s0 }
  0xc6   :  { %262 = vrot.lane.b32.xlu0 %v255_v8, %s902_s0 }
  0xc7   :  { %264 = vrot.lane.b32.xlu1 %v257_v6, %s902_s0 }
 0x10c   :  { %v90_v10 = vpop.permute.xlu0 %89 }
 0x10d   :  { %v92_v9 = vpop.permute.xlu1 %91 }
 0x110   :  { %v105_v14 = vpop.permute.xlu0 %104 }
 0x111   :  { %v107_v12 = vpop.permute.xlu1 %106 }
 0x112   :  { %v113_v33 = vsel %vm112_vm15, %v105_v14, %v107_v12 }
 0x114   :  { %v94_v16 = vpop.permute.xlu0 %93 }
 0x115   :  { %v96_v15 = vpop.permute.xlu1 %95 }
 0x116   :  { %v99_v46 = vsel %vm97_vm2, %v94_v16, %v96_v15 }
 0x117   :  { %v103_v55 = vsel %vm26_vm0, %v99_v46, %v961_v13 }
 0x118   :  { %v109_v19 = vpop.permute.xlu0 %108 }
 0x119   :  { %v111_v18 = vpop.permute.xlu1 %110 }
 0x11a   :  { %v114_v39 = vsel %vm112_vm15, %v109_v19, %v111_v18 }
 0x11b   :  { %v118_v48 = vsel %vm29_vm1, %v99_v46, %v114_v39 }
 0x11c   :  { %v143_v22 = vpop.permute.xlu0 %142  ;;  %v202_v58 = vsub.f32 %v118_v48, %v103_v55 }
 0x11d   :  { %v145_v21 = vpop.permute.xlu1 %144 }
 0x11e   :  { %v150_v27 = vsel %vm112_vm15, %v143_v22, %v145_v21 }
 0x11f   :  { %v154_v28 = vsel %vm29_vm1, %v936_v1, %v150_v27  ;;  %v98_v1 = vsel %vm97_vm2, %v90_v10, %v92_v9 }
 0x120   :  { %v147_v26 = vpop.permute.xlu0 %146  ;;  %v203_v34 = vsub.f32 %v154_v28, %v131_v7  ;;  %v117_v38 = vsel %vm29_vm1, %v98_v1, %v113_v33  ;;  %v102_v31 = vsel %vm26_vm0, %v98_v1, %v953_v11 }
 0x121   :  { %v149_v25 = vpop.permute.xlu1 %148 }
 0x122   :  { %v151_v32 = vsel %vm112_vm15, %v147_v26, %v149_v25  ;;  %v205_v40 = vmul.f32 2.0, %v203_v34 }
 0x123   :  { %v155_v24 = vsel %vm29_vm1, %v934_v0, %v151_v32  ;;  %v201_v0 = vsub.f32 %v117_v38, %v102_v31 }
 0x124   :  { %v172_v30 = vpop.permute.xlu0 %171  ;;  %v204_v42 = vsub.f32 %v155_v24, %v132_v35 }
 0x125   :  { %v174_v29 = vpop.permute.xlu1 %173  ;;  %v207_v52 = vadd.f32 %v205_v40, %v201_v0 }
 0x126   :  { %v179_v43 = vsel %vm97_vm2, %v172_v30, %v174_v29  ;;  %v206_v53 = vmul.f32 2.0, %v204_v42 }
 0x127   :  { %v185_v50 = vsel %vm26_vm0, %v179_v43, %v989_v41 }
 0x128   :  { %v176_v37 = vpop.permute.xlu0 %175  ;;  %v208_v62 = vadd.f32 %v206_v53, %v202_v58  ;;  %v215_v9 = vsub.f32 %v185_v50, %v102_v31 }
 0x129   :  { %v178_v36 = vpop.permute.xlu1 %177 }
 0x12a   :  { %v180_v11 = vsel %vm97_vm2, %v176_v37, %v178_v36 }
 0x12b   :  { %v186_v41 = vsel %vm26_vm0, %v180_v11, %v996_v49 }
 0x12c   :  { %v188_v45 = vpop.permute.xlu0 %187  ;;  %v216_v17 = vsub.f32 %v186_v41, %v103_v55 }
 0x12d   :  { %v190_v44 = vpop.permute.xlu1 %189 }
 0x12e   :  { %v195_v47 = vsel %vm112_vm15, %v188_v45, %v190_v44 }
 0x12f   :  { %v199_v51 = vsel %vm29_vm1, %v179_v43, %v195_v47 }
 0x130   :  { %v209_v54 = vsub.f32 %v199_v51, %v185_v50  ;;  %v192_v57 = vpop.permute.xlu0 %191  ;;  %v272_v16 = vsub.f32 %v199_v51, %v117_v38 }
 0x131   :  { %v194_v56 = vpop.permute.xlu1 %193 }
 0x132   :  { %v211_v59 = vadd.f32 %v209_v54, %v207_v52  ;;  %v196_v60 = vsel %vm112_vm15, %v192_v57, %v194_v56 }
 0x133   :  { %v200_v61 = vsel %vm29_vm1, %v180_v11, %v196_v60 }
 0x134   :  { %v1070_v63 = vmul.f32 0.125, %v211_v59  ;;  %v210_v2 = vsub.f32 %v200_v61, %v186_v41  ;;  %v259_v4 = vpop.permute.xlu0 %258  ;;  %v273_v25 = vsub.f32 %v200_v61, %v118_v48 }
 0x135   :  { %v261_v3 = vpop.permute.xlu1 %260 }
 0x136   :  { %v284_v13 = vmul.f32 %v1070_v63, %v1070_v63  ;;  %v212_v5 = vadd.f32 %v210_v2, %v208_v62  ;;  %v266_v6 = vsel %vm97_vm2, %v259_v4, %v261_v3 }
 0x137   :  { %v270_v14 = vadd.f32 %v266_v6, %v215_v9 }
 0x138   :  { %286 = vst [vmem:[#allocation3 + $0x3] sm:$0xff] %v284_v13  ;;  %v1075_v8 = vmul.f32 0.125, %v212_v5  ;;  %v263_v10 = vpop.permute.xlu0 %262  ;;  %v300_v43 = vmul.f32 0.39905027, %v284_v13 }
 0x139   :  { %v265_v49 = vpop.permute.xlu1 %264  ;;  %v274_v18 = vadd.f32 %v272_v16, %v270_v14 }
 0x13a   :  { %v285_v12 = vmul.f32 %v1075_v8, %v1075_v8  ;;  %v267_v15 = vsel %vm97_vm2, %v263_v10, %v265_v49 }
 0x13b   :  { %v271_v19 = vadd.f32 %v267_v15, %v216_v17  ;;  %v276_v26 = vmul.f32 0.125, %v274_v18 }
 0x13c   :  { %287 = vst [vmem:[#allocation3 + $0xb] sm:$0xff] %v285_v12  ;;  %v301_v53 = vmul.f32 0.39905027, %v285_v12 }
 0x13d   :  { %v275_v27 = vadd.f32 %v273_v25, %v271_v19  ;;  %v460_v36 = vmul.f32 %v276_v26, %v276_v26  ;;  %v632_v10 = vmul.f32 %v276_v26, %v1070_v63 }
 0x13f   :  { %v288_v20 = vld [vmem:[#allocation3 + $0x4] sm:$0x1]  ;;  %v292_v21 = vld [vmem:[#allocation3 + $0x5] sm:$0x1]  ;;  %v296_v22 = vld [vmem:[#allocation3 + $0x6] sm:$0x1] }
 0x140   :  { %289 = vst [vmem:[#allocation3 + $0x2] sm:$0x1] %v288_v20  ;;  %293 = vst [vmem:[#allocation3 + $0x1] sm:$0x1] %v292_v21  ;;  %v277_v37 = vmul.f32 0.125, %v275_v27 }
 0x141   :  { %297 = vst [vmem:[#allocation3] sm:$0x1] %v296_v22  ;;  %v476_v21 = vmul.f32 0.39905027, %v460_v36 }
 0x142   :  { %v461_v31 = vmul.f32 %v277_v37, %v277_v37  ;;  %v633_v22 = vmul.f32 %v277_v37, %v1075_v8 }
 0x143   :  { %v290_v7 = vld [vmem:[#allocation3 + $0x11] sm:$0x1]  ;;  %v294_v28 = vld [vmem:[#allocation3 + $0x10] sm:$0x1]  ;;  %v298_v29 = vld [vmem:[#allocation3 + $0xf] sm:$0x1] }
 0x144   :  { %291 = vst [vmem:[#allocation3 + $0x13] sm:$0x1] %v290_v7  ;;  %295 = vst [vmem:[#allocation3 + $0x14] sm:$0x1] %v294_v28  ;;  %v303_v30 = vld [vmem:[#allocation3 + $0xa] sm:$0xff] }
 0x145   :  { %299 = vst [vmem:[#allocation3 + $0x15] sm:$0x1] %v298_v29  ;;  %v304_v32 = vld [vmem:[#allocation3 + $0x4] sm:$0xff] }
 0x146   :  { %v313_v33 = vld [vmem:[#allocation3 + $0x9] sm:$0xff] }
 0x147   :  { %v314_v34 = vld [vmem:[#allocation3 + $0x5] sm:$0xff] }
 0x148   :  { %v323_v35 = vld [vmem:[#allocation3 + $0x8] sm:$0xff]  ;;  %v322_v39 = vld [vmem:[#allocation3] sm:$0xff] }
 0x149   :  { %v324_v24 = vld [vmem:[#allocation3 + $0x6] sm:$0xff] }
 0x14a   :  { %v302_v1 = vld [vmem:[#allocation3 + $0x2] sm:$0xff]  ;;  %v326_v45 = vadd.f32 %v324_v24, %v322_v39 }
 0x14b   :  { %v312_v38 = vld [vmem:[#allocation3 + $0x1] sm:$0xff]  ;;  %v306_v40 = vadd.f32 %v304_v32, %v302_v1  ;;  %v305_v0 = vld [vmem:[#allocation3 + $0xc] sm:$0xff] }
 0x14c   :  { %462 = vst [vmem:[#allocation3 + $0x3] sm:$0xff] %v460_v36  ;;  %v316_v42 = vadd.f32 %v314_v34, %v312_v38  ;;  %v315_v46 = vld [vmem:[#allocation3 + $0xd] sm:$0xff]  ;;  %v307_v51 = vadd.f32 %v305_v0, %v303_v30  ;;  %v328_v54 = vmul.f32 0.004433048, %v326_v45 }
 0x14d   :  { %v308_v44 = vmul.f32 0.24203622, %v306_v40  ;;  %v325_v47 = vld [vmem:[#allocation3 + $0xe] sm:$0xff]  ;;  %v317_v52 = vadd.f32 %v315_v46, %v313_v33  ;;  %v477_v33 = vmul.f32 0.39905027, %v461_v31 }
 0x14e   :  { %463 = vst [vmem:[#allocation3 + $0xb] sm:$0xff] %v461_v31  ;;  %v318_v50 = vmul.f32 0.054005582, %v316_v42  ;;  %v309_v55 = vmul.f32 0.24203622, %v307_v51  ;;  %v327_v56 = vadd.f32 %v325_v47, %v323_v35 }
 0x14f   :  { %v310_v48 = vadd.f32 %v308_v44, %v300_v43  ;;  %v319_v61 = vmul.f32 0.054005582, %v317_v52 }
 0x150   :  { %v311_v41 = vadd.f32 %v309_v55, %v301_v53  ;;  %v329_v2 = vmul.f32 0.004433048, %v327_v56 }
 0x151   :  { %v320_v11 = vadd.f32 %v318_v50, %v310_v48 }
 0x152   :  { %v321_v62 = vadd.f32 %v319_v61, %v311_v41 }
 0x153   :  { %v464_v57 = vld [vmem:[#allocation3 + $0x4] sm:$0x1]  ;;  %v468_v58 = vld [vmem:[#allocation3 + $0x5] sm:$0x1]  ;;  %v472_v59 = vld [vmem:[#allocation3 + $0x6] sm:$0x1]  ;;  %v1080_v60 = vadd.f32 %v328_v54, %v320_v11 }
 0x154   :  { %465 = vst [vmem:[#allocation3 + $0x2] sm:$0x1] %v464_v57  ;;  %469 = vst [vmem:[#allocation3 + $0x1] sm:$0x1] %v468_v58  ;;  %v1084_v5 = vadd.f32 %v329_v2, %v321_v62  ;;  %v648_v54 = vmul.f32 0.39905027, %v632_v10 }
 0x155   :  { %473 = vst [vmem:[#allocation3] sm:$0x1] %v472_v59  ;;  %334 = vrot.lane.b32.xlu0 %v1080_v60, %s904_s22  ;;  %v466_v3 = vld [vmem:[#allocation3 + $0x11] sm:$0x1]  ;;  %v470_v4 = vld [vmem:[#allocation3 + $0x10] sm:$0x1] }
 0x156   :  { %v474_v13 = vld [vmem:[#allocation3 + $0xf] sm:$0x1]  ;;  %467 = vst [vmem:[#allocation3 + $0x13] sm:$0x1] %v466_v3  ;;  %471 = vst [vmem:[#allocation3 + $0x14] sm:$0x1] %v470_v4  ;;  %336 = vrot.lane.b32.xlu1 %v1084_v5, %s904_s22 }
 0x157   :  { %475 = vst [vmem:[#allocation3 + $0x15] sm:$0x1] %v474_v13  ;;  %v479_v6 = vld [vmem:[#allocation3 + $0xa] sm:$0xff]  ;;  %v649_v3 = vmul.f32 0.39905027, %v633_v22 }
 0x158   :  { %v480_v9 = vld [vmem:[#allocation3 + $0x4] sm:$0xff] }
 0x159   :  { %v489_v49 = vld [vmem:[#allocation3 + $0x9] sm:$0xff] }
 0x15a   :  { %v490_v12 = vld [vmem:[#allocation3 + $0x5] sm:$0xff] }
 0x15b   :  { %v499_v14 = vld [vmem:[#allocation3 + $0x8] sm:$0xff] }
 0x15c   :  { %v500_v15 = vld [vmem:[#allocation3 + $0x6] sm:$0xff] }
 0x15d   :  { %v478_v16 = vld [vmem:[#allocation3 + $0x2] sm:$0xff]  ;;  %v481_v7 = vld [vmem:[#allocation3 + $0xc] sm:$0xff] }
 0x15e   :  { %v488_v17 = vld [vmem:[#allocation3 + $0x1] sm:$0xff]  ;;  %v482_v19 = vadd.f32 %v480_v9, %v478_v16  ;;  %v491_v28 = vld [vmem:[#allocation3 + $0xd] sm:$0xff]  ;;  %v483_v26 = vadd.f32 %v481_v7, %v479_v6 }
 0x15f   :  { %v498_v18 = vld [vmem:[#allocation3] sm:$0xff]  ;;  %v492_v20 = vadd.f32 %v490_v12, %v488_v17  ;;  %v501_v63 = vld [vmem:[#allocation3 + $0xe] sm:$0xff]  ;;  %v493_v32 = vadd.f32 %v491_v28, %v489_v49 }
 0x160   :  { %634 = vst [vmem:[#allocation3 + $0x3] sm:$0xff] %v632_v10  ;;  %v484_v25 = vmul.f32 0.24203622, %v482_v19  ;;  %v502_v27 = vadd.f32 %v500_v15, %v498_v18  ;;  %635 = vst [vmem:[#allocation3 + $0xb] sm:$0xff] %v633_v22  ;;  %v485_v34 = vmul.f32 0.24203622, %v483_v26  ;;  %v503_v1 = vadd.f32 %v501_v63, %v499_v14 }
 0x161   :  { %v494_v30 = vmul.f32 0.054005582, %v492_v20  ;;  %v495_v37 = vmul.f32 0.054005582, %v493_v32 }
 0x162   :  { %v486_v29 = vadd.f32 %v484_v25, %v476_v21  ;;  %v504_v24 = vmul.f32 0.004433048, %v502_v27  ;;  %v487_v40 = vadd.f32 %v485_v34, %v477_v33  ;;  %v505_v43 = vmul.f32 0.004433048, %v503_v1 }
 0x164   :  { %v496_v35 = vadd.f32 %v494_v30, %v486_v29  ;;  %v497_v42 = vadd.f32 %v495_v37, %v487_v40 }
 0x166   :  { %v1090_v8 = vadd.f32 %v504_v24, %v496_v35  ;;  %v1094_v44 = vadd.f32 %v505_v43, %v497_v42 }
 0x167   :  { %v636_v38 = vld [vmem:[#allocation3 + $0x4] sm:$0x1]  ;;  %v640_v39 = vld [vmem:[#allocation3 + $0x5] sm:$0x1]  ;;  %v644_v36 = vld [vmem:[#allocation3 + $0x6] sm:$0x1] }
 0x168   :  { %637 = vst [vmem:[#allocation3 + $0x2] sm:$0x1] %v636_v38  ;;  %641 = vst [vmem:[#allocation3 + $0x1] sm:$0x1] %v640_v39  ;;  %510 = vrot.lane.b32.xlu0 %v1090_v8, %s904_s22  ;;  %v638_v31 = vld [vmem:[#allocation3 + $0x11] sm:$0x1]  ;;  %512 = vrot.lane.b32.xlu1 %v1094_v44, %s904_s22 }
 0x169   :  { %645 = vst [vmem:[#allocation3] sm:$0x1] %v644_v36  ;;  %639 = vst [vmem:[#allocation3 + $0x13] sm:$0x1] %v638_v31  ;;  %v642_v45 = vld [vmem:[#allocation3 + $0x10] sm:$0x1] }
 0x16a   :  { %643 = vst [vmem:[#allocation3 + $0x14] sm:$0x1] %v642_v45  ;;  %v646_v0 = vld [vmem:[#allocation3 + $0xf] sm:$0x1]  ;;  %v652_v46 = vld [vmem:[#allocation3 + $0x4] sm:$0xff] }
 0x16b   :  { %v662_v47 = vld [vmem:[#allocation3 + $0x5] sm:$0xff]  ;;  %647 = vst [vmem:[#allocation3 + $0x15] sm:$0x1] %v646_v0 }
 0x16c   :  { %v672_v11 = vld [vmem:[#allocation3 + $0x6] sm:$0xff] }
 0x16d   :  { %v651_v57 = vld [vmem:[#allocation3 + $0xa] sm:$0xff] }
 0x16e   :  { %v661_v62 = vld [vmem:[#allocation3 + $0x9] sm:$0xff] }
 0x16f   :  { %v650_v48 = vld [vmem:[#allocation3 + $0x2] sm:$0xff] }
 0x170   :  { %v660_v50 = vld [vmem:[#allocation3 + $0x1] sm:$0xff]  ;;  %v654_v52 = vadd.f32 %v652_v46, %v650_v48  ;;  %v653_v58 = vld [vmem:[#allocation3 + $0xc] sm:$0xff] }
 0x171   :  { %v670_v51 = vld [vmem:[#allocation3] sm:$0xff]  ;;  %v664_v53 = vadd.f32 %v662_v47, %v660_v50  ;;  %v655_v59 = vadd.f32 %v653_v58, %v651_v57  ;;  %v663_v2 = vld [vmem:[#allocation3 + $0xd] sm:$0xff] }
 0x172   :  { %v656_v55 = vmul.f32 0.24203622, %v654_v52  ;;  %v674_v56 = vadd.f32 %v672_v11, %v670_v51  ;;  %v665_v4 = vadd.f32 %v663_v2, %v661_v62  ;;  %v671_v13 = vld [vmem:[#allocation3 + $0x8] sm:$0xff] }
 0x173   :  { %v666_v61 = vmul.f32 0.054005582, %v664_v53  ;;  %v673_v6 = vld [vmem:[#allocation3 + $0xe] sm:$0xff]  ;;  %v657_v9 = vmul.f32 0.24203622, %v655_v59 }
 0x174   :  { %v658_v41 = vadd.f32 %v656_v55, %v648_v54  ;;  %v676_v12 = vmul.f32 0.004433048, %v674_v56  ;;  %v675_v14 = vadd.f32 %v673_v6, %v671_v13  ;;  %v667_v10 = vmul.f32 0.054005582, %v665_v4 }
 0x175   :  { %v659_v15 = vadd.f32 %v657_v9, %v649_v3  ;;  %v349_v6 = vmul.f32 0.39905027, %v1080_v60 }
 0x176   :  { %v668_v49 = vadd.f32 %v666_v61, %v658_v41  ;;  %v677_v18 = vmul.f32 0.004433048, %v675_v14 }
 0x177   :  { %v669_v17 = vadd.f32 %v667_v10, %v659_v15 }
 0x178   :  { %v1098_v16 = vadd.f32 %v676_v12, %v668_v49 }
 0x179   :  { %v1102_v19 = vadd.f32 %v677_v18, %v669_v17 }
 0x17a   :  { %682 = vrot.lane.b32.xlu0 %v1098_v16, %s904_s22 }
 0x17b   :  { %684 = vrot.lane.b32.xlu1 %v1102_v19, %s904_s22 }
 0x1c7   :  { %v335_v20 = vpop.permute.xlu0 %334 }
 0x1c8   :  { %341 = vst.msk [vmem:[#allocation4] sm:$0xff] %vm340_vm3, %v335_v20  ;;  %v337_v21 = vpop.permute.xlu1 %336 }
 0x1c9   :  { %342 = vst.msk [vmem:[#allocation4 + $0x8] sm:$0xff] %vm278_vm13, %v335_v20  ;;  %344 = vst.msk [vmem:[#allocation4 + $0x18] sm:$0xff] %vm278_vm13, %v337_v21 }
 0x1ca   :  { %343 = vst.msk [vmem:[#allocation4 + $0x10] sm:$0xff] %vm340_vm3, %v337_v21 }
 0x1cf   :  { %v1110_v25 = vld [vmem:[#allocation4] sm:$0xff] }
 0x1d0   :  { %v347_v22 = vld [vmem:[#allocation4 + $0x8] sm:$0xff]  ;;  %355 = vrot.lane.b32.xlu0 %v1110_v25, %s905_s23  ;;  %v348_v27 = vld [vmem:[#allocation4 + $0x18] sm:$0xff] }
 0x1d1   :  { %357 = vrot.lane.b32.xlu1 %v347_v22, %s905_s23  ;;  %v1115_v7 = vld [vmem:[#allocation4 + $0x10] sm:$0xff] }
 0x1d4   :  { %359 = vrot.lane.b32.xlu0 %v1115_v7, %s905_s23 }
 0x1d5   :  { %361 = vrot.lane.b32.xlu1 %v348_v27, %s905_s23 }
 0x1d8   :  { %368 = vrot.lane.b32.xlu0 %v1110_v25, %s903_s21 }
 0x1d9   :  { %370 = vrot.lane.b32.xlu1 %v347_v22, %s903_s21 }
 0x1da   :  { %v511_v28 = vpop.permute.xlu0 %510  ;;  %v513_v63 = vpop.permute.xlu1 %512 }
 0x1db   :  { %516 = vst.msk [vmem:[#allocation4] sm:$0xff] %vm340_vm3, %v511_v28  ;;  %518 = vst.msk [vmem:[#allocation4 + $0x10] sm:$0xff] %vm340_vm3, %v513_v63 }
 0x1dc   :  { %517 = vst.msk [vmem:[#allocation4 + $0x8] sm:$0xff] %vm278_vm13, %v511_v28  ;;  %519 = vst.msk [vmem:[#allocation4 + $0x18] sm:$0xff] %vm278_vm13, %v513_v63  ;;  %372 = vrot.lane.b32.xlu0 %v1115_v7, %s903_s21  ;;  %v350_v28 = vmul.f32 0.39905027, %v1084_v5 }
 0x1dd   :  { %374 = vrot.lane.b32.xlu1 %v348_v27, %s903_s21 }
 0x1e0   :  { %390 = vrot.lane.b32.xlu0 %v1110_v25, %s906_s24 }
 0x1e1   :  { %392 = vrot.lane.b32.xlu1 %v347_v22, %s906_s24 }
 0x1e2   :  { %v1136_v26 = vld [vmem:[#allocation4] sm:$0xff]  ;;  %v1143_v32 = vld [vmem:[#allocation4 + $0x10] sm:$0xff] }
 0x1e3   :  { %v522_v29 = vld [vmem:[#allocation4 + $0x8] sm:$0xff]  ;;  %v523_v33 = vld [vmem:[#allocation4 + $0x18] sm:$0xff] }
 0x1e4   :  { %394 = vrot.lane.b32.xlu0 %v1115_v7, %s906_s24 }
 0x1e5   :  { %396 = vrot.lane.b32.xlu1 %v348_v27, %s906_s24 }
 0x1e8   :  { %403 = vrot.lane.b32.xlu0 %v1110_v25, %s902_s0 }
 0x1e9   :  { %405 = vrot.lane.b32.xlu1 %v347_v22, %s902_s0 }
 0x1ec   :  { %v683_v30 = vpop.permute.xlu0 %682  ;;  %407 = vrot.lane.b32.xlu0 %v1115_v7, %s902_s0 }
 0x1ed   :  { %688 = vst.msk [vmem:[#allocation4] sm:$0xff] %vm340_vm3, %v683_v30  ;;  %v685_v34 = vpop.permute.xlu1 %684  ;;  %409 = vrot.lane.b32.xlu1 %v348_v27, %s902_s0 }
 0x1ee   :  { %689 = vst.msk [vmem:[#allocation4 + $0x8] sm:$0xff] %vm278_vm13, %v683_v30  ;;  %691 = vst.msk [vmem:[#allocation4 + $0x18] sm:$0xff] %vm278_vm13, %v685_v34 }
 0x1ef   :  { %690 = vst.msk [vmem:[#allocation4 + $0x10] sm:$0xff] %vm340_vm3, %v685_v34 }
 0x1f0   :  { %429 = vrot.lane.b32.xlu0 %v1110_v25, %s907_s25 }
 0x1f1   :  { %431 = vrot.lane.b32.xlu1 %v347_v22, %s907_s25 }
 0x1f4   :  { %433 = vrot.lane.b32.xlu0 %v1115_v7, %s907_s25  ;;  %v1186_v24 = vld [vmem:[#allocation4] sm:$0xff] }
 0x1f5   :  { %435 = vrot.lane.b32.xlu1 %v348_v27, %s907_s25  ;;  %v694_v35 = vld [vmem:[#allocation4 + $0x8] sm:$0xff]  ;;  %v695_v1 = vld [vmem:[#allocation4 + $0x18] sm:$0xff] }
 0x1f6   :  { %v1191_v38 = vld [vmem:[#allocation4 + $0x10] sm:$0xff] }
 0x1f8   :  { %530 = vrot.lane.b32.xlu0 %v1136_v26, %s905_s23 }
 0x1f9   :  { %532 = vrot.lane.b32.xlu1 %v522_v29, %s905_s23 }
 0x1fc   :  { %534 = vrot.lane.b32.xlu0 %v1143_v32, %s905_s23 }
 0x1fd   :  { %536 = vrot.lane.b32.xlu1 %v523_v33, %s905_s23 }
 0x200   :  { %542 = vrot.lane.b32.xlu0 %v1136_v26, %s903_s21 }
 0x201   :  { %544 = vrot.lane.b32.xlu1 %v522_v29, %s903_s21 }
 0x204   :  { %546 = vrot.lane.b32.xlu0 %v1143_v32, %s903_s21 }
 0x205   :  { %548 = vrot.lane.b32.xlu1 %v523_v33, %s903_s21 }
 0x208   :  { %564 = vrot.lane.b32.xlu0 %v1136_v26, %s906_s24 }
 0x209   :  { %566 = vrot.lane.b32.xlu1 %v522_v29, %s906_s24 }
 0x20c   :  { %568 = vrot.lane.b32.xlu0 %v1143_v32, %s906_s24 }
 0x20d   :  { %570 = vrot.lane.b32.xlu1 %v523_v33, %s906_s24 }
 0x210   :  { %576 = vrot.lane.b32.xlu0 %v1136_v26, %s902_s0 }
 0x211   :  { %578 = vrot.lane.b32.xlu1 %v522_v29, %s902_s0 }
 0x214   :  { %580 = vrot.lane.b32.xlu0 %v1143_v32, %s902_s0 }
 0x215   :  { %582 = vrot.lane.b32.xlu1 %v523_v33, %s902_s0 }
 0x218   :  { %602 = vrot.lane.b32.xlu0 %v1136_v26, %s907_s25 }
 0x219   :  { %604 = vrot.lane.b32.xlu1 %v522_v29, %s907_s25 }
 0x21c   :  { %606 = vrot.lane.b32.xlu0 %v1143_v32, %s907_s25 }
 0x21d   :  { %608 = vrot.lane.b32.xlu1 %v523_v33, %s907_s25 }
 0x220   :  { %702 = vrot.lane.b32.xlu0 %v1186_v24, %s905_s23 }
 0x221   :  { %704 = vrot.lane.b32.xlu1 %v694_v35, %s905_s23 }
 0x224   :  { %706 = vrot.lane.b32.xlu0 %v1191_v38, %s905_s23 }
 0x225   :  { %708 = vrot.lane.b32.xlu1 %v695_v1, %s905_s23 }
 0x228   :  { %714 = vrot.lane.b32.xlu0 %v1186_v24, %s903_s21 }
 0x229   :  { %716 = vrot.lane.b32.xlu1 %v694_v35, %s903_s21 }
 0x22c   :  { %718 = vrot.lane.b32.xlu0 %v1191_v38, %s903_s21 }
 0x22d   :  { %720 = vrot.lane.b32.xlu1 %v695_v1, %s903_s21 }
 0x230   :  { %736 = vrot.lane.b32.xlu0 %v1186_v24, %s906_s24 }
 0x231   :  { %738 = vrot.lane.b32.xlu1 %v694_v35, %s906_s24 }
 0x234   :  { %740 = vrot.lane.b32.xlu0 %v1191_v38, %s906_s24 }
 0x235   :  { %742 = vrot.lane.b32.xlu1 %v695_v1, %s906_s24 }
 0x238   :  { %748 = vrot.lane.b32.xlu0 %v1186_v24, %s902_s0 }
 0x239   :  { %750 = vrot.lane.b32.xlu1 %v694_v35, %s902_s0 }
 0x23c   :  { %752 = vrot.lane.b32.xlu0 %v1191_v38, %s902_s0 }
 0x23d   :  { %754 = vrot.lane.b32.xlu1 %v695_v1, %s902_s0 }
 0x240   :  { %774 = vrot.lane.b32.xlu0 %v1186_v24, %s907_s25 }
 0x241   :  { %776 = vrot.lane.b32.xlu1 %v694_v35, %s907_s25 }
 0x242   :  { %v356_v36 = vpop.permute.xlu0 %355 }
 0x243   :  { %v358_v39 = vpop.permute.xlu1 %357 }
 0x244   :  { %v1218_v40 = vsel %vm363_vm4, %v356_v36, %v358_v39  ;;  %778 = vrot.lane.b32.xlu0 %v1191_v38, %s907_s25 }
 0x245   :  { %780 = vrot.lane.b32.xlu1 %v695_v1, %s907_s25 }
 0x246   :  { %v360_v42 = vpop.permute.xlu0 %359 }
 0x247   :  { %v362_v37 = vpop.permute.xlu1 %361 }
 0x248   :  { %v1224_v43 = vsel %vm363_vm4, %v360_v42, %v362_v37 }
 0x24a   :  { %v369_v45 = vpop.permute.xlu0 %368 }
 0x24b   :  { %v371_v31 = vpop.permute.xlu1 %370 }
 0x24c   :  { %v376_v0 = vsel %vm112_vm15, %v369_v45, %v371_v31 }
 0x24d   :  { %v380_v46 = vsel %vm26_vm0, %v1218_v40, %v376_v0  ;;  %v382_v47 = vsel %vm29_vm1, %v376_v0, %v1218_v40 }
 0x24e   :  { %v384_v48 = vadd.f32 %v382_v47, %v380_v46  ;;  %v373_v51 = vpop.permute.xlu0 %372 }
 0x24f   :  { %v375_v50 = vpop.permute.xlu1 %374 }
 0x250   :  { %v377_v52 = vsel %vm112_vm15, %v373_v51, %v375_v50  ;;  %v386_v2 = vmul.f32 0.24203622, %v384_v48 }
 0x251   :  { %v381_v53 = vsel %vm26_vm0, %v1224_v43, %v377_v52  ;;  %v383_v11 = vsel %vm29_vm1, %v377_v52, %v1224_v43 }
 0x252   :  { %v385_v54 = vadd.f32 %v383_v11, %v381_v53  ;;  %v391_v56 = vpop.permute.xlu0 %390  ;;  %v388_v10 = vadd.f32 %v386_v2, %v349_v6 }
 0x253   :  { %v393_v55 = vpop.permute.xlu1 %392 }
 0x254   :  { %v399_v57 = vsel %vm398_vm5, %v391_v56, %v393_v55  ;;  %v387_v18 = vmul.f32 0.24203622, %v385_v54 }
 0x256   :  { %v395_v59 = vpop.permute.xlu0 %394  ;;  %v389_v35 = vadd.f32 %v387_v18, %v350_v28 }
 0x257   :  { %v397_v58 = vpop.permute.xlu1 %396 }
 0x258   :  { %v400_v41 = vsel %vm398_vm5, %v395_v59, %v397_v58 }
 0x25a   :  { %v404_v62 = vpop.permute.xlu0 %403 }
 0x25b   :  { %v406_v61 = vpop.permute.xlu1 %405 }
 0x25c   :  { %v411_v3 = vsel %vm97_vm2, %v404_v62, %v406_v61 }
 0x25d   :  { %v415_v4 = vsel %vm26_vm0, %v399_v57, %v411_v3  ;;  %v419_v13 = vsel %vm29_vm1, %v411_v3, %v399_v57 }
 0x25e   :  { %v417_v9 = vsel %vm27_vm6, %v1080_v60, %v415_v4  ;;  %v421_v49 = vsel %vm30_vm7, %v1080_v60, %v419_v13  ;;  %v408_v15 = vpop.permute.xlu0 %407 }
 0x25f   :  { %v423_v12 = vadd.f32 %v421_v49, %v417_v9  ;;  %v410_v14 = vpop.permute.xlu1 %409 }
 0x260   :  { %v412_v17 = vsel %vm97_vm2, %v408_v15, %v410_v14 }
 0x261   :  { %v425_v20 = vmul.f32 0.054005582, %v423_v12  ;;  %v416_v21 = vsel %vm26_vm0, %v400_v41, %v412_v17  ;;  %v420_v22 = vsel %vm29_vm1, %v412_v17, %v400_v41 }
 0x262   :  { %v418_v27 = vsel %vm27_vm6, %v1084_v5, %v416_v21  ;;  %v422_v60 = vsel %vm30_vm7, %v1084_v5, %v420_v22  ;;  %v430_v33 = vpop.permute.xlu0 %429 }
 0x263   :  { %v427_v63 = vadd.f32 %v425_v20, %v388_v10  ;;  %v424_v29 = vadd.f32 %v422_v60, %v418_v27  ;;  %v432_v30 = vpop.permute.xlu1 %431 }
 0x264   :  { %v438_v34 = vsel %vm437_vm8, %v430_v33, %v432_v30 }
 0x265   :  { %v426_v1 = vmul.f32 0.054005582, %v424_v29  ;;  %v442_v39 = vsel %vm26_vm0, %v438_v34, %v1110_v25  ;;  %v448_v5 = vsel %vm29_vm1, %v1110_v25, %v438_v34 }
 0x266   :  { %v444_v36 = vsel %vm27_vm6, %v1218_v40, %v442_v39  ;;  %v450_v37 = vsel %vm30_vm7, %v376_v0, %v448_v5  ;;  %v434_v47 = vpop.permute.xlu0 %433 }
 0x267   :  { %v428_v42 = vadd.f32 %v426_v1, %v389_v35  ;;  %v446_v31 = vsel %vm28_vm9, %v376_v0, %v444_v36  ;;  %v452_v45 = vsel %vm31_vm10, %v1218_v40, %v450_v37  ;;  %v436_v46 = vpop.permute.xlu1 %435 }
 0x268   :  { %v454_v48 = vadd.f32 %v452_v45, %v446_v31  ;;  %v439_v25 = vsel %vm437_vm8, %v434_v47, %v436_v46 }
 0x269   :  { %v443_v50 = vsel %vm26_vm0, %v439_v25, %v1115_v7  ;;  %v449_v51 = vsel %vm29_vm1, %v1115_v7, %v439_v25  ;;  %v524_v25 = vmul.f32 0.39905027, %v1090_v8 }
 0x26a   :  { %v456_v53 = vmul.f32 0.004433048, %v454_v48  ;;  %v445_v0 = vsel %vm27_vm6, %v1224_v43, %v443_v50  ;;  %v451_v40 = vsel %vm30_vm7, %v377_v52, %v449_v51  ;;  %v531_v56 = vpop.permute.xlu0 %530 }
 0x26b   :  { %v447_v11 = vsel %vm28_vm9, %v377_v52, %v445_v0  ;;  %v453_v54 = vsel %vm31_vm10, %v1224_v43, %v451_v40  ;;  %v533_v55 = vpop.permute.xlu1 %532 }
 0x26c   :  { %v455_v57 = vadd.f32 %v453_v54, %v447_v11  ;;  %v538_v7 = vsel %vm363_vm4, %v531_v56, %v533_v55  ;;  %v1305_v58 = vadd.f32 %v456_v53, %v427_v63 }
 0x26e   :  { %v457_v59 = vmul.f32 0.004433048, %v455_v57  ;;  %v535_v61 = vpop.permute.xlu0 %534 }
 0x26f   :  { %v537_v41 = vpop.permute.xlu1 %536 }
 0x270   :  { %v1308_v62 = vsel %vm363_vm4, %v535_v61, %v537_v41  ;;  %v1310_v2 = vadd.f32 %v457_v59, %v428_v42  ;;  %v525_v61 = vmul.f32 0.39905027, %v1094_v44 }
 0x272   :  { %v543_v3 = vpop.permute.xlu0 %542 }
 0x273   :  { %v545_v52 = vpop.permute.xlu1 %544 }
 0x274   :  { %v550_v12 = vsel %vm112_vm15, %v543_v3, %v545_v52 }
 0x275   :  { %v554_v10 = vsel %vm26_vm0, %v538_v7, %v550_v12  ;;  %v556_v17 = vsel %vm29_vm1, %v550_v12, %v538_v7 }
 0x276   :  { %v547_v13 = vpop.permute.xlu0 %546  ;;  %v558_v63 = vadd.f32 %v556_v17, %v554_v10 }
 0x277   :  { %v549_v4 = vpop.permute.xlu1 %548 }
 0x278   :  { %v551_v21 = vsel %vm112_vm15, %v547_v13, %v549_v4  ;;  %v560_v37 = vmul.f32 0.24203622, %v558_v63 }
 0x279   :  { %v555_v33 = vsel %vm26_vm0, %v1308_v62, %v551_v21  ;;  %v557_v1 = vsel %vm29_vm1, %v551_v21, %v1308_v62 }
 0x27a   :  { %v565_v6 = vpop.permute.xlu0 %564  ;;  %v559_v47 = vadd.f32 %v557_v1, %v555_v33  ;;  %v562_v54 = vadd.f32 %v560_v37, %v524_v25 }
 0x27b   :  { %v567_v43 = vpop.permute.xlu1 %566 }
 0x27c   :  { %v572_v18 = vsel %vm398_vm5, %v565_v6, %v567_v43  ;;  %v561_v59 = vmul.f32 0.24203622, %v559_v47 }
 0x27e   :  { %v569_v49 = vpop.permute.xlu0 %568 }
 0x27f   :  { %v571_v9 = vpop.permute.xlu1 %570 }
 0x280   :  { %v573_v34 = vsel %vm398_vm5, %v569_v49, %v571_v9 }
 0x282   :  { %v577_v15 = vpop.permute.xlu0 %576 }
 0x283   :  { %v579_v14 = vpop.permute.xlu1 %578 }
 0x284   :  { %v584_v20 = vsel %vm97_vm2, %v577_v15, %v579_v14  ;;  %v563_v14 = vadd.f32 %v561_v59, %v525_v61 }
 0x285   :  { %v588_v22 = vsel %vm26_vm0, %v572_v18, %v584_v20  ;;  %v592_v27 = vsel %vm29_vm1, %v584_v20, %v572_v18 }
 0x286   :  { %v590_v60 = vsel %vm27_vm6, %v1090_v8, %v588_v22  ;;  %v594_v28 = vsel %vm30_vm7, %v1090_v8, %v592_v27  ;;  %v581_v30 = vpop.permute.xlu0 %580 }
 0x287   :  { %v583_v29 = vpop.permute.xlu1 %582  ;;  %v596_v39 = vadd.f32 %v594_v28, %v590_v60 }
 0x288   :  { %v585_v35 = vsel %vm97_vm2, %v581_v30, %v583_v29 }
 0x289   :  { %v589_v5 = vsel %vm26_vm0, %v573_v34, %v585_v35  ;;  %v593_v36 = vsel %vm29_vm1, %v585_v35, %v573_v34  ;;  %v598_v50 = vmul.f32 0.054005582, %v596_v39 }
 0x28a   :  { %v591_v42 = vsel %vm27_vm6, %v1094_v44, %v589_v5  ;;  %v595_v31 = vsel %vm30_vm7, %v1094_v44, %v593_v36  ;;  %v603_v46 = vpop.permute.xlu0 %602 }
 0x28b   :  { %v605_v45 = vpop.permute.xlu1 %604  ;;  %v597_v0 = vadd.f32 %v595_v31, %v591_v42  ;;  %v600_v52 = vadd.f32 %v598_v50, %v562_v54 }
 0x28c   :  { %v610_v48 = vsel %vm437_vm8, %v603_v46, %v605_v45 }
 0x28d   :  { %v614_v51 = vsel %vm26_vm0, %v610_v48, %v1136_v26  ;;  %v620_v53 = vsel %vm29_vm1, %v1136_v26, %v610_v48  ;;  %v599_v13 = vmul.f32 0.054005582, %v597_v0 }
 0x28e   :  { %v616_v40 = vsel %vm27_vm6, %v538_v7, %v614_v51  ;;  %v622_v11 = vsel %vm30_vm7, %v550_v12, %v620_v53  ;;  %v607_v57 = vpop.permute.xlu0 %606 }
 0x28f   :  { %v618_v8 = vsel %vm28_vm9, %v550_v12, %v616_v40  ;;  %v624_v55 = vsel %vm31_vm10, %v538_v7, %v622_v11  ;;  %v609_v56 = vpop.permute.xlu1 %608  ;;  %v601_v10 = vadd.f32 %v599_v13, %v563_v14  ;;  %v696_v13 = vmul.f32 0.39905027, %v1098_v16 }
 0x290   :  { %v626_v41 = vadd.f32 %v624_v55, %v618_v8  ;;  %v611_v26 = vsel %vm437_vm8, %v607_v57, %v609_v56 }
 0x291   :  { %v615_v3 = vsel %vm26_vm0, %v611_v26, %v1143_v32  ;;  %v621_v4 = vsel %vm29_vm1, %v1143_v32, %v611_v26 }
 0x292   :  { %v628_v43 = vmul.f32 0.004433048, %v626_v41  ;;  %v617_v7 = vsel %vm27_vm6, %v1308_v62, %v615_v3  ;;  %v623_v6 = vsel %vm30_vm7, %v551_v21, %v621_v4  ;;  %v703_v12 = vpop.permute.xlu0 %702 }
 0x293   :  { %v619_v44 = vsel %vm28_vm9, %v551_v21, %v617_v7  ;;  %v625_v9 = vsel %vm31_vm10, %v1308_v62, %v623_v6  ;;  %v705_v49 = vpop.permute.xlu1 %704 }
 0x294   :  { %v627_v32 = vadd.f32 %v625_v9, %v619_v44  ;;  %v630_v15 = vadd.f32 %v628_v43, %v600_v52  ;;  %v710_v39 = vsel %vm363_vm4, %v703_v12, %v705_v49 }
 0x296   :  { %v629_v17 = vmul.f32 0.004433048, %v627_v32  ;;  %v1383_v18 = vmul.f32 %v630_v15, %v1305_v58  ;;  %v1386_v20 = vadd.f32 %v630_v15, %v1305_v58  ;;  %v707_v27 = vpop.permute.xlu0 %706 }
 0x297   :  { %v709_v22 = vpop.permute.xlu1 %708 }
 0x298   :  { %v631_v21 = vadd.f32 %v629_v17, %v601_v10  ;;  %v711_v50 = vsel %vm363_vm4, %v707_v27, %v709_v22  ;;  %v697_v22 = vmul.f32 0.39905027, %v1102_v19 }
 0x29a   :  { %v1389_v60 = vmul.f32 %v631_v21, %v1310_v2  ;;  %v1392_v62 = vadd.f32 %v631_v21, %v1310_v2  ;;  %v715_v63 = vpop.permute.xlu0 %714 }
 0x29b   :  { %v717_v28 = vpop.permute.xlu1 %716 }
 0x29c   :  { %v722_v58 = vsel %vm112_vm15, %v715_v63, %v717_v28 }
 0x29d   :  { %v726_v37 = vsel %vm26_vm0, %v710_v39, %v722_v58  ;;  %v728_v2 = vsel %vm29_vm1, %v722_v58, %v710_v39 }
 0x29e   :  { %v719_v30 = vpop.permute.xlu0 %718  ;;  %v730_v51 = vadd.f32 %v728_v2, %v726_v37 }
 0x29f   :  { %v721_v29 = vpop.permute.xlu1 %720 }
 0x2a0   :  { %v723_v45 = vsel %vm112_vm15, %v719_v30, %v721_v29  ;;  %v732_v59 = vmul.f32 0.24203622, %v730_v51 }
 0x2a1   :  { %v727_v40 = vsel %vm26_vm0, %v711_v50, %v723_v45  ;;  %v729_v8 = vsel %vm29_vm1, %v723_v45, %v711_v50 }
 0x2a2   :  { %v737_v34 = vpop.permute.xlu0 %736  ;;  %v731_v3 = vadd.f32 %v729_v8, %v727_v40  ;;  %v734_v12 = vadd.f32 %v732_v59, %v696_v13 }
 0x2a3   :  { %v739_v33 = vpop.permute.xlu1 %738 }
 0x2a4   :  { %v744_v42 = vsel %vm398_vm5, %v737_v34, %v739_v33  ;;  %v733_v10 = vmul.f32 0.24203622, %v731_v3 }
 0x2a6   :  { %v741_v1 = vpop.permute.xlu0 %740 }
 0x2a7   :  { %v743_v35 = vpop.permute.xlu1 %742 }
 0x2a8   :  { %v745_v11 = vsel %vm398_vm5, %v741_v1, %v743_v35  ;;  %v735_v35 = vadd.f32 %v733_v10, %v697_v22 }
 0x2aa   :  { %v749_v36 = vpop.permute.xlu0 %748 }
 0x2ab   :  { %v751_v5 = vpop.permute.xlu1 %750 }
 0x2ac   :  { %v756_v31 = vsel %vm97_vm2, %v749_v36, %v751_v5 }
 0x2ad   :  { %v760_v46 = vsel %vm26_vm0, %v744_v42, %v756_v31  ;;  %v764_v47 = vsel %vm29_vm1, %v756_v31, %v744_v42  ;;  %v813_v42 = vmul.f32 0.04, %v1392_v62 }
 0x2ae   :  { %v762_v48 = vsel %vm27_vm6, %v1098_v16, %v760_v46  ;;  %v766_v25 = vsel %vm30_vm7, %v1098_v16, %v764_v47  ;;  %v753_v0 = vpop.permute.xlu0 %752 }
 0x2af   :  { %v755_v53 = vpop.permute.xlu1 %754  ;;  %v768_v55 = vadd.f32 %v766_v25, %v762_v48  ;;  %v815_v47 = vmul.f32 %v813_v42, %v1392_v62 }
 0x2b0   :  { %v757_v54 = vsel %vm97_vm2, %v753_v0, %v755_v53 }
 0x2b1   :  { %v761_v56 = vsel %vm26_vm0, %v745_v11, %v757_v54  ;;  %v765_v57 = vsel %vm29_vm1, %v757_v54, %v745_v11  ;;  %v770_v43 = vmul.f32 0.054005582, %v768_v55 }
 0x2b2   :  { %v763_v41 = vsel %vm27_vm6, %v1102_v19, %v761_v56  ;;  %v767_v26 = vsel %vm30_vm7, %v1102_v19, %v765_v57  ;;  %v775_v52 = vpop.permute.xlu0 %774 }
 0x2b3   :  { %v777_v61 = vpop.permute.xlu1 %776  ;;  %v769_v44 = vadd.f32 %v767_v26, %v763_v41  ;;  %v772_v27 = vadd.f32 %v770_v43, %v734_v12 }
 0x2b4   :  { %v782_v4 = vsel %vm437_vm8, %v775_v52, %v777_v61 }
 0x2b5   :  { %v786_v7 = vsel %vm26_vm0, %v782_v4, %v1186_v24  ;;  %v792_v6 = vsel %vm29_vm1, %v1186_v24, %v782_v4  ;;  %v771_v63 = vmul.f32 0.054005582, %v769_v44 }
 0x2b6   :  { %v788_v9 = vsel %vm27_vm6, %v710_v39, %v786_v7  ;;  %v794_v49 = vsel %vm30_vm7, %v722_v58, %v792_v6  ;;  %v779_v15 = vpop.permute.xlu0 %778 }
 0x2b7   :  { %v790_v16 = vsel %vm28_vm9, %v722_v58, %v788_v9  ;;  %v796_v14 = vsel %vm31_vm10, %v710_v39, %v794_v49  ;;  %v781_v32 = vpop.permute.xlu1 %780  ;;  %v812_v39 = vmul.f32 0.04, %v1386_v20 }
 0x2b8   :  { %v798_v17 = vadd.f32 %v796_v14, %v790_v16  ;;  %v783_v24 = vsel %vm437_vm8, %v779_v15, %v781_v32 }
 0x2b9   :  { %v787_v21 = vsel %vm26_vm0, %v783_v24, %v1191_v38  ;;  %v793_v28 = vsel %vm29_vm1, %v1191_v38, %v783_v24  ;;  %v773_v38 = vadd.f32 %v771_v63, %v735_v35  ;;  %v814_v31 = vmul.f32 %v812_v39, %v1386_v20 }
 0x2ba   :  { %v800_v29 = vmul.f32 0.004433048, %v798_v17  ;;  %v789_v30 = vsel %vm27_vm6, %v711_v50, %v787_v21  ;;  %v795_v33 = vsel %vm30_vm7, %v723_v45, %v793_v28 }
 0x2bb   :  { %v791_v19 = vsel %vm28_vm9, %v723_v45, %v789_v30  ;;  %v797_v34 = vsel %vm31_vm10, %v711_v50, %v795_v33 }
 0x2bc   :  { %v799_v1 = vadd.f32 %v797_v34, %v791_v19  ;;  %v802_v58 = vadd.f32 %v800_v29, %v772_v27 }
 0x2be   :  { %v801_v5 = vmul.f32 0.004433048, %v799_v1  ;;  %v806_v36 = vmul.f32 %v802_v58, %v802_v58 }
 0x2c0   :  { %v803_v37 = vadd.f32 %v801_v5, %v773_v38  ;;  %v808_v2 = vsub.f32 %v1383_v18, %v806_v36 }
 0x2c2   :  { %v807_v46 = vmul.f32 %v803_v37, %v803_v37  ;;  %v816_v45 = vsub.f32 %v808_v2, %v814_v31 }
 0x2c4   :  { %v809_v23 = vsub.f32 %v1389_v60, %v807_v46  ;;  %818 = vst [vmem:[#allocation8] sm:$0xff] %v816_v45 }
 0x2c6   :  { %v817_v48 = vsub.f32 %v809_v23, %v815_v47 }
 0x2c8   :  { %819 = vst [vmem:[#allocation8 + $0x8] sm:$0xff] %v817_v48 }
 0x2c9   :  { %882 = shalt.err (!%p879_p12)
}
 0x2ca   :  { %s883_s2 = scalar_lea.hbm %s1484_s1, 256 }
 0x2cb   :  { %p884_p13 = scmp.ne.s32.totalorder %s1484_s1, %s883_s2  ;;  %p887_p0 = scmp.lt.u32.totalorder %s883_s2, %s1484_s1 }
 0x2cd   :  { %p889_p1 = pnand %p887_p0, %p884_p13 }
 0x2cf   :  { %892 = shalt.err (!%p889_p1)
}
 0x2d0   :  { %831 = dma.vmem_to_hbm [thread:$0]  %s826_s27, 256, %s1484_s1, [#allocation7], %s898_s16, %s898_s16, %s899_s17  }
 0x2d1   :  { %895 = dma.done.wait [#allocation7], 256  }
 0x2d2   :  { %896 = vsyncadd [#allocation7], 4294967040 }
 0x2d3   :  { %835 = vsyncpa [#allocation6], 1 }
 0x2d4   :  { %836 = vsyncpa [#allocation7], 1 }

</bundles_post_ra>
